<compile_context>
chip_gen: v7x
topology: tpu7x:2x2x1
jax: 0.10.0
libtpu: 0.0.40
codegen_flags: <defaults>
</compile_context>

<pallas_src>
import jax
import jax.numpy as jnp
from jax.experimental import pallas as pl
from jax.experimental.pallas import tpu as pltpu


def _round_up(v, m):
    return ((v + m - 1) // m) * m


# ---------------------------------------------------------------------------
# Pallas kernels
# ---------------------------------------------------------------------------
def _gemm_bias_lrelu_kernel(p_ref, w_ref, b_ref, o_ref):
    # w_ref: (Cout, K) bf16, resident (BN scale already folded in)
    # p_ref: (K, TM)  bf16 patch tile (lane dim TM is a multiple of 128)
    # b_ref: (Cout, 1) f32 folded BN bias
    # o_ref: (Cout, TM) lane-dense output tile (bf16)
    y = jnp.dot(w_ref[...], p_ref[...], preferred_element_type=jnp.float32)
    y = y + b_ref[...]
    o_ref[...] = jnp.maximum(y, 0.2 * y).astype(o_ref.dtype)     # LeakyReLU(0.2)


def _gemm_bias_lrelu_head_kernel(p_ref, w_ref, b_ref, w4_ref, sel_ref, o_ref):
    # blk3 GEMM + folded BN + LeakyReLU, then the fused blk4 head:
    # the 8x8 valid conv is a per-batch dot product over the resident
    # (Cout3, B*64) activations, followed by sigmoid.
    y = jnp.dot(w_ref[...], p_ref[...], preferred_element_type=jnp.float32)  # (C3, M)
    y = y + b_ref[...]
    y = jnp.maximum(y, 0.2 * y)                                   # blk3 activations
    p = y * w4_ref[...]                                           # (C3, M)
    t = jnp.dot(p, sel_ref[...], preferred_element_type=jnp.float32)  # (C3, B)
    logit = jnp.sum(t, axis=0, keepdims=True)                     # (1, B)
    o_ref[...] = jax.nn.sigmoid(logit)


# ---------------------------------------------------------------------------
# pallas_call wrappers
# ---------------------------------------------------------------------------
def _conv_gemm(patches, w, bias):
    """(Cout, K) @ (K, M) + bias + LeakyReLU, full-M blocks, lane-dense out."""
    k, m = patches.shape
    cout = w.shape[0]
    m_pad = _round_up(m, 128)
    if m_pad != m:
        patches = jnp.pad(patches, ((0, 0), (0, m_pad - m)))
    # Keep 2 "parallel" steps when the M tile stays a multiple of 128 so v7x
    # can shard across its two TensorCores; otherwise one full-M block.
    n_tiles = 2 if m_pad % 256 == 0 else 1
    tm = m_pad // n_tiles

    out = pl.pallas_call(
        _gemm_bias_lrelu_kernel,
        out_shape=jax.ShapeDtypeStruct((cout, m_pad), jnp.bfloat16),
        grid_spec=pltpu.PrefetchScalarGridSpec(
            num_scalar_prefetch=0,
            grid=(n_tiles,),
            in_specs=[
                pl.BlockSpec((k, tm), lambda i: (0, i)),      # patches: streamed
                pl.BlockSpec((cout, k), lambda i: (0, 0)),    # weights: resident
                pl.BlockSpec((cout, 1), lambda i: (0, 0)),    # folded BN bias
            ],
            out_specs=pl.BlockSpec((cout, tm), lambda i: (0, i)),
        ),
        compiler_params=pltpu.CompilerParams(
            dimension_semantics=("parallel",)),
    )(patches, w, bias)
    return out[:, :m]


def _head_call(patches, w3, b3, w4t, sel):
    """blk3 GEMM + fused blk4 head; returns sigmoid probabilities (1, B)."""
    k, m = patches.shape
    m_pad = _round_up(m, 128)
    if m_pad != m:
        patches = jnp.pad(patches, ((0, 0), (0, m_pad - m)))
    cout = w3.shape[0]
    nb = sel.shape[1]
    assert w4t.shape == (cout, m_pad) and sel.shape == (m_pad, nb)

    return pl.pallas_call(
        _gemm_bias_lrelu_head_kernel,
        out_shape=jax.ShapeDtypeStruct((1, nb), jnp.float32),
        grid_spec=pltpu.PrefetchScalarGridSpec(
            num_scalar_prefetch=0,
            grid=(1,),
            in_specs=[
                pl.BlockSpec((k, m_pad), lambda i: (0, 0)),
                pl.BlockSpec((cout, k), lambda i: (0, 0)),
                pl.BlockSpec((cout, 1), lambda i: (0, 0)),
                pl.BlockSpec((cout, m_pad), lambda i: (0, 0)),   # tiled blk4 weight
                pl.BlockSpec((m_pad, nb), lambda i: (0, 0)),     # per-batch selector
            ],
            out_specs=pl.BlockSpec((1, nb), lambda i: (0, 0)),
        ),
        compiler_params=pltpu.CompilerParams(
            dimension_semantics=("arbitrary",)),
    )(patches, w3, b3, w4t, sel)


# ---------------------------------------------------------------------------
# Layout plumbing (JAX wrapper): channel-major im2col
# ---------------------------------------------------------------------------
def _im2col_cfirst(x, kh, kw, stride, padding):
    """(C, B, H, W) -> ((C*kh*kw, B*Ho*Wo), Ho, Wo)  (K rows ordered (ci,ki,kj))."""
    c, b, h, w = x.shape
    ho = (h + 2 * padding - kh) // stride + 1
    wo = (w + 2 * padding - kw) // stride + 1
    xp = jnp.pad(x, ((0, 0), (0, 0), (padding, padding), (padding, padding)))
    cols = []
    for ki in range(kh):
        for kj in range(kw):
            sl = jax.lax.slice(
                xp,
                (0, 0, ki, kj),
                (c, b, ki + (ho - 1) * stride + 1, kj + (wo - 1) * stride + 1),
                (1, 1, stride, stride),
            )                                   # (C, B, Ho, Wo)
            cols.append(sl.reshape(c, b * ho * wo))
    patches = jnp.stack(cols, axis=1)           # (C, kh*kw, M)
    return patches.reshape(c * kh * kw, b * ho * wo), ho, wo


def _conv_layer(x_cbhw, w_packed, bias_col):
    """One k=4/s=2/p=1 conv + folded BN + LeakyReLU; channel-major in/out."""
    _, b, _, _ = x_cbhw.shape
    patches, ho, wo = _im2col_cfirst(x_cbhw, 4, 4, 2, 1)
    y = _conv_gemm(patches, w_packed, bias_col)          # (Cout, B*Ho*Wo) bf16
    return y.reshape(w_packed.shape[0], b, ho, wo)


def _head_layer(x_cbhw, w3, b3, w4t, sel):
    patches, ho, wo = _im2col_cfirst(x_cbhw, 4, 4, 2, 1)
    if ho != 8 or wo != 8:
        # TODO(synk): blk4's 8x8 valid conv assumes a 64x64 network input; other
        # resolutions would need a spatial head which is not implemented here.
        raise ValueError(f"head expects an 8x8 blk3 feature map, got {ho}x{wo}")
    return _head_call(patches, w3, b3, w4t, sel)          # (1, B) f32


def discriminator_forward(x, packed):
    """x: (B, Cin, H, W) NCHW float32. Returns (B, 1, 1, 1) sigmoid probs."""
    (w1, b1), (w2, b2), (w3, b3, w4t, sel) = packed
    nb = x.shape[0]
    xc = jnp.transpose(x, (1, 0, 2, 3)).astype(jnp.bfloat16)   # (Cin, B, H, W)
    a1 = _conv_layer(xc, w1, b1)                               # (fm,   B, 32, 32)
    a2 = _conv_layer(a1, w2, b2)                               # (2fm,  B, 16, 16)
    probs = _head_layer(a2, w3, b3, w4t, sel)                  # (1, B) f32
    return probs.reshape(nb, 1, 1, 1)


# ---------------------------------------------------------------------------
# Parameter init / packing
# ---------------------------------------------------------------------------
def init_params(key, in_channel, feature_maps):
    """Raw params mimicking the PyTorch module (eval-mode BN folded to affine)."""
    eps = 1e-5
    shapes = [
        (feature_maps, in_channel, 4, 4),
        (feature_maps * 2, feature_maps, 4, 4),
        (feature_maps * 4, feature_maps * 2, 4, 4),
        (1, feature_maps * 4, 8, 8),
    ]
    params = []
    for i, shp in enumerate(shapes):
        key, kw_, kg, kb, km, kv = jax.random.split(key, 6)
        w = 0.02 * jax.random.normal(kw_, shp, jnp.float32)   # nn.init.normal_(std=0.02)
        if i < 3:
            cout = shp[0]
            gamma = 1.0 + 0.1 * jax.random.normal(kg, (cout,), jnp.float32)
            beta = 0.1 * jax.random.normal(kb, (cout,), jnp.float32)
            running_mean = 0.1 * jax.random.normal(km, (cout,), jnp.float32)
            running_var = 1.0 + 0.1 * jax.random.uniform(kv, (cout,), jnp.float32)
            scale = gamma * jax.lax.rsqrt(running_var + eps)
            bias = beta - running_mean * scale
            params.append((w, scale, bias))
        else:
            params.append((w,))
    return params


def pack_params(params, batch):
    """Fold BN scale into bf16 weight matrices; pre-tile the blk4 head weight."""
    (w1, s1, b1), (w2, s2, b2), (w3, s3, b3), (w4,) = params

    def pack_block(w, scale, bias):
        cout = w.shape[0]
        wt = (w.reshape(cout, -1) * scale[:, None]).astype(jnp.bfloat16)  # (Cout, K)
        return wt, bias.reshape(cout, 1).astype(jnp.float32)

    p1 = pack_block(w1, s1, b1)
    p2 = pack_block(w2, s2, b2)
    w3t, b3c = pack_block(w3, s3, b3)

    c3, hw = w4.shape[1], w4.shape[2] * w4.shape[3]           # (64 ch, 8*8)
    m = batch * hw
    m_pad = _round_up(m, 128)
    w4t = jnp.tile(w4.reshape(c3, hw), (1, batch)).astype(jnp.float32)
    w4t = jnp.pad(w4t, ((0, 0), (0, m_pad - m)))              # (c3, m_pad)
    sel = (jnp.arange(m_pad)[:, None] // hw
           == jnp.arange(batch)[None, :]).astype(jnp.float32)  # (m_pad, batch)
    return p1, p2, (w3t, b3c, w4t, sel)


# ---------------------------------------------------------------------------
# Pure-JAX reference (correctness check)
# ---------------------------------------------------------------------------
def _ref_conv_block(x, w, scale, bias, *, stride, padding, act):
    y = jax.lax.conv_general_dilated(
        x, w, (stride, stride), [(padding, padding)] * 2,
        dimension_numbers=("NCHW", "OIHW", "NCHW"))
    y = y * scale.reshape(1, -1, 1, 1) + bias.reshape(1, -1, 1, 1)
    if act == "leaky_relu":
        return jnp.where(y > 0, y, 0.2 * y)
    return jax.nn.sigmoid(y)


if __name__ == "__main__":
    IN_CH, FMAPS, B, H, W = 3, 16, 2, 64, 64   # 64x64 input implied by final k=8 conv
    key = jax.random.PRNGKey(0)
    key, kx = jax.random.split(key)
    x = jax.random.normal(kx, (B, IN_CH, H, W), jnp.float32)
    params = init_params(key, IN_CH, FMAPS)
    packed = pack_params(params, B)            # one-time, outside the jitted forward

    fwd = jax.jit(discriminator_forward)
    out = fwd(x, packed)
    jax.block_until_ready(out)
    assert out.shape == (B, 1, 1, 1)
    assert bool(jnp.all((out >= 0.0) & (out <= 1.0)))         # sigmoid range

    # Correctness: first block against lax.conv reference (bf16 path => loose tol)
    w1, s1, b1 = params[0]
    w1p, b1p = packed[0]
    a1 = _conv_layer(jnp.transpose(x, (1, 0, 2, 3)).astype(jnp.bfloat16), w1p, b1p)
    blk1_pl = jnp.transpose(a1.astype(jnp.float32), (1, 0, 2, 3))   # back to NCHW
    blk1_ref = _ref_conv_block(x, w1, s1, b1, stride=2, padding=1, act="leaky_relu")
    assert bool(jnp.allclose(blk1_pl, blk1_ref, atol=2e-2, rtol=2e-2))

    # Correctness: full forward against lax.conv reference
    ref = x
    acts = ["leaky_relu", "leaky_relu", "leaky_relu", "sigmoid"]
    strides = [2, 2, 2, 1]
    pads = [1, 1, 1, 0]
    for i, p in enumerate(params):
        wgt = p[0]
        if len(p) == 3:
            sc, bi = p[1], p[2]
        else:
            sc = jnp.ones((wgt.shape[0],), jnp.float32)
            bi = jnp.zeros((wgt.shape[0],), jnp.float32)
        ref = _ref_conv_block(ref, wgt, sc, bi, stride=strides[i],
                              padding=pads[i], act=acts[i])
    assert bool(jnp.allclose(out, ref, atol=2e-2, rtol=2e-2))

    print("KERNEL_OK")
</pallas_src>

<mosaic_0001>
module attributes {stable_mosaic.version = 11 : i64} {
  func.func @_gemm_bias_lrelu_kernel(%arg0: i32, %arg1: memref<48x1024xbf16, #tpu.memory_space<vmem>>, %arg2: memref<16x48xbf16, #tpu.memory_space<vmem>>, %arg3: memref<16x1xf32, #tpu.memory_space<vmem>>, %arg4: memref<16x1024xbf16, #tpu.memory_space<vmem>>) attributes {dimension_semantics = [#tpu.dimension_semantics<parallel>], iteration_bounds = array<i64: 2>, scalar_prefetch = 0 : i64, scratch_operands = 0 : i64, tpu.core_type = #tpu.core_type<tc>, window_params = [{transform_indices = @transform_0, window_bounds = array<i64: 48, 1024>}, {pipeline_mode = #tpu.pipeline_mode<synchronous>, transform_indices = @transform_1, window_bounds = array<i64: 16, 48>}, {pipeline_mode = #tpu.pipeline_mode<synchronous>, transform_indices = @transform_2, window_bounds = array<i64: 16, 1>}, {transform_indices = @transform_3, window_bounds = array<i64: 16, 1024>}]} {
    %c0 = arith.constant 0 : index
    %c0_0 = arith.constant 0 : index
    %0 = vector.load %arg2[%c0, %c0_0] : memref<16x48xbf16, #tpu.memory_space<vmem>>, vector<16x48xbf16>
    %c0_1 = arith.constant 0 : index
    %c0_2 = arith.constant 0 : index
    %1 = vector.load %arg1[%c0_1, %c0_2] : memref<48x1024xbf16, #tpu.memory_space<vmem>>, vector<48x1024xbf16>
    %cst = arith.constant dense<0.000000e+00> : vector<16x1024xf32>
    %2 = tpu.matmul %0, %1, %cst {dimension_numbers = #tpu.dot_dimension_numbers<[1], [0], [0], [1], [0, 0, 1, 1], [], []>} : vector<16x48xbf16>, vector<48x1024xbf16>, vector<16x1024xf32> -> vector<16x1024xf32>
    %c0_3 = arith.constant 0 : index
    %c0_4 = arith.constant 0 : index
    %3 = vector.load %arg3[%c0_3, %c0_4] : memref<16x1xf32, #tpu.memory_space<vmem>>, vector<16x1xf32>
    %4 = vector.broadcast %3 : vector<16x1xf32> to vector<16x1024xf32>
    %5 = arith.addf %2, %4 : vector<16x1024xf32>
    %cst_5 = arith.constant 2.000000e-01 : f32
    %6 = vector.broadcast %cst_5 : f32 to vector<16x1024xf32>
    %7 = arith.mulf %6, %5 : vector<16x1024xf32>
    %8 = arith.maximumf %5, %7 : vector<16x1024xf32>
    %9 = arith.truncf %8 : vector<16x1024xf32> to vector<16x1024xbf16>
    %c0_6 = arith.constant 0 : index
    %c0_7 = arith.constant 0 : index
    %10 = vector.load %arg4[%c0_6, %c0_7] : memref<16x1024xbf16, #tpu.memory_space<vmem>>, vector<16x1024xbf16>
    tpu.vector_store %arg4[%c0_6, %c0_7], %9 {strides = array<i32>} : memref<16x1024xbf16, #tpu.memory_space<vmem>>, vector<16x1024xbf16>,
    return
  }
  func.func @transform_0(%arg0: i32) -> (i32, i32) {
    %c0_i32 = arith.constant 0 : i32
    %c0_i32_0 = arith.constant 0 : i32
    return %c0_i32, %arg0 : i32, i32
  }
  func.func @transform_1(%arg0: i32) -> (i32, i32) {
    %c0_i32 = arith.constant 0 : i32
    %c0_i32_0 = arith.constant 0 : i32
    %c0_i32_1 = arith.constant 0 : i32
    return %c0_i32, %c0_i32_0 : i32, i32
  }
  func.func @transform_2(%arg0: i32) -> (i32, i32) {
    %c0_i32 = arith.constant 0 : i32
    %c0_i32_0 = arith.constant 0 : i32
    %c0_i32_1 = arith.constant 0 : i32
    return %c0_i32, %c0_i32_0 : i32, i32
  }
  func.func @transform_3(%arg0: i32) -> (i32, i32) {
    %c0_i32 = arith.constant 0 : i32
    %c0_i32_0 = arith.constant 0 : i32
    return %c0_i32, %arg0 : i32, i32
  }
}

module attributes {stable_mosaic.version = 11 : i64} {
  func.func @_gemm_bias_lrelu_kernel(%arg0: i32, %arg1: memref<256x256xbf16, #tpu.memory_space<vmem>>, %arg2: memref<32x256xbf16, #tpu.memory_space<vmem>>, %arg3: memref<32x1xf32, #tpu.memory_space<vmem>>, %arg4: memref<32x256xbf16, #tpu.memory_space<vmem>>) attributes {dimension_semantics = [#tpu.dimension_semantics<parallel>], iteration_bounds = array<i64: 2>, scalar_prefetch = 0 : i64, scratch_operands = 0 : i64, tpu.core_type = #tpu.core_type<tc>, window_params = [{transform_indices = @transform_0, window_bounds = array<i64: 256, 256>}, {pipeline_mode = #tpu.pipeline_mode<synchronous>, transform_indices = @transform_1, window_bounds = array<i64: 32, 256>}, {pipeline_mode = #tpu.pipeline_mode<synchronous>, transform_indices = @transform_2, window_bounds = array<i64: 32, 1>}, {transform_indices = @transform_3, window_bounds = array<i64: 32, 256>}]} {
    %c0 = arith.constant 0 : index
    %c0_0 = arith.constant 0 : index
    %0 = vector.load %arg2[%c0, %c0_0] : memref<32x256xbf16, #tpu.memory_space<vmem>>, vector<32x256xbf16>
    %c0_1 = arith.constant 0 : index
    %c0_2 = arith.constant 0 : index
    %1 = vector.load %arg1[%c0_1, %c0_2] : memref<256x256xbf16, #tpu.memory_space<vmem>>, vector<256x256xbf16>
    %cst = arith.constant dense<0.000000e+00> : vector<32x256xf32>
    %2 = tpu.matmul %0, %1, %cst {dimension_numbers = #tpu.dot_dimension_numbers<[1], [0], [0], [1], [0, 0, 1, 1], [], []>} : vector<32x256xbf16>, vector<256x256xbf16>, vector<32x256xf32> -> vector<32x256xf32>
    %c0_3 = arith.constant 0 : index
    %c0_4 = arith.constant 0 : index
    %3 = vector.load %arg3[%c0_3, %c0_4] : memref<32x1xf32, #tpu.memory_space<vmem>>, vector<32x1xf32>
    %4 = vector.broadcast %3 : vector<32x1xf32> to vector<32x256xf32>
    %5 = arith.addf %2, %4 : vector<32x256xf32>
    %cst_5 = arith.constant 2.000000e-01 : f32
    %6 = vector.broadcast %cst_5 : f32 to vector<32x256xf32>
    %7 = arith.mulf %6, %5 : vector<32x256xf32>
    %8 = arith.maximumf %5, %7 : vector<32x256xf32>
    %9 = arith.truncf %8 : vector<32x256xf32> to vector<32x256xbf16>
    %c0_6 = arith.constant 0 : index
    %c0_7 = arith.constant 0 : index
    %10 = vector.load %arg4[%c0_6, %c0_7] : memref<32x256xbf16, #tpu.memory_space<vmem>>, vector<32x256xbf16>
    tpu.vector_store %arg4[%c0_6, %c0_7], %9 {strides = array<i32>} : memref<32x256xbf16, #tpu.memory_space<vmem>>, vector<32x256xbf16>,
    return
  }
  func.func @transform_0(%arg0: i32) -> (i32, i32) {
    %c0_i32 = arith.constant 0 : i32
    %c0_i32_0 = arith.constant 0 : i32
    return %c0_i32, %arg0 : i32, i32
  }
  func.func @transform_1(%arg0: i32) -> (i32, i32) {
    %c0_i32 = arith.constant 0 : i32
    %c0_i32_0 = arith.constant 0 : i32
    %c0_i32_1 = arith.constant 0 : i32
    return %c0_i32, %c0_i32_0 : i32, i32
  }
  func.func @transform_2(%arg0: i32) -> (i32, i32) {
    %c0_i32 = arith.constant 0 : i32
    %c0_i32_0 = arith.constant 0 : i32
    %c0_i32_1 = arith.constant 0 : i32
    return %c0_i32, %c0_i32_0 : i32, i32
  }
  func.func @transform_3(%arg0: i32) -> (i32, i32) {
    %c0_i32 = arith.constant 0 : i32
    %c0_i32_0 = arith.constant 0 : i32
    return %c0_i32, %arg0 : i32, i32
  }
}

module attributes {stable_mosaic.version = 11 : i64} {
  func.func @_gemm_bias_lrelu_head_kernel(%arg0: i32, %arg1: memref<512x128xbf16, #tpu.memory_space<vmem>>, %arg2: memref<64x512xbf16, #tpu.memory_space<vmem>>, %arg3: memref<64x1xf32, #tpu.memory_space<vmem>>, %arg4: memref<64x128xf32, #tpu.memory_space<vmem>>, %arg5: memref<128x2xf32, #tpu.memory_space<vmem>>, %arg6: memref<1x2xf32, #tpu.memory_space<vmem>>) attributes {dimension_semantics = [#tpu.dimension_semantics<arbitrary>], iteration_bounds = array<i64: 1>, scalar_prefetch = 0 : i64, scratch_operands = 0 : i64, tpu.core_type = #tpu.core_type<tc>, window_params = [{pipeline_mode = #tpu.pipeline_mode<synchronous>, transform_indices = @transform_0, window_bounds = array<i64: 512, 128>}, {pipeline_mode = #tpu.pipeline_mode<synchronous>, transform_indices = @transform_1, window_bounds = array<i64: 64, 512>}, {pipeline_mode = #tpu.pipeline_mode<synchronous>, transform_indices = @transform_2, window_bounds = array<i64: 64, 1>}, {pipeline_mode = #tpu.pipeline_mode<synchronous>, transform_indices = @transform_3, window_bounds = array<i64: 64, 128>}, {pipeline_mode = #tpu.pipeline_mode<synchronous>, transform_indices = @transform_4, window_bounds = array<i64: 128, 2>}, {pipeline_mode = #tpu.pipeline_mode<synchronous>, transform_indices = @transform_5, window_bounds = array<i64: 1, 2>}]} {
    %c0 = arith.constant 0 : index
    %c0_0 = arith.constant 0 : index
    %0 = vector.load %arg2[%c0, %c0_0] : memref<64x512xbf16, #tpu.memory_space<vmem>>, vector<64x512xbf16>
    %c0_1 = arith.constant 0 : index
    %c0_2 = arith.constant 0 : index
    %1 = vector.load %arg1[%c0_1, %c0_2] : memref<512x128xbf16, #tpu.memory_space<vmem>>, vector<512x128xbf16>
    %cst = arith.constant dense<0.000000e+00> : vector<64x128xf32>
    %2 = tpu.matmul %0, %1, %cst {dimension_numbers = #tpu.dot_dimension_numbers<[1], [0], [0], [1], [0, 0, 1, 1], [], []>} : vector<64x512xbf16>, vector<512x128xbf16>, vector<64x128xf32> -> vector<64x128xf32>
    %c0_3 = arith.constant 0 : index
    %c0_4 = arith.constant 0 : index
    %3 = vector.load %arg3[%c0_3, %c0_4] : memref<64x1xf32, #tpu.memory_space<vmem>>, vector<64x1xf32>
    %4 = vector.broadcast %3 : vector<64x1xf32> to vector<64x128xf32>
    %5 = arith.addf %2, %4 : vector<64x128xf32>
    %cst_5 = arith.constant 2.000000e-01 : f32
    %6 = vector.broadcast %cst_5 : f32 to vector<64x128xf32>
    %7 = arith.mulf %6, %5 : vector<64x128xf32>
    %8 = arith.maximumf %5, %7 : vector<64x128xf32>
    %c0_6 = arith.constant 0 : index
    %c0_7 = arith.constant 0 : index
    %9 = vector.load %arg4[%c0_6, %c0_7] : memref<64x128xf32, #tpu.memory_space<vmem>>, vector<64x128xf32>
    %10 = arith.mulf %8, %9 : vector<64x128xf32>
    %c0_8 = arith.constant 0 : index
    %c0_9 = arith.constant 0 : index
    %11 = vector.load %arg5[%c0_8, %c0_9] : memref<128x2xf32, #tpu.memory_space<vmem>>, vector<128x2xf32>
    %cst_10 = arith.constant dense<0.000000e+00> : vector<64x2xf32>
    %12 = tpu.matmul %10, %11, %cst_10 {dimension_numbers = #tpu.dot_dimension_numbers<[1], [0], [0], [1], [0, 0, 1, 1], [], []>} : vector<64x128xf32>, vector<128x2xf32>, vector<64x2xf32> -> vector<64x2xf32>
    %cst_11 = arith.constant dense<0.000000e+00> : vector<2xf32>
    %13 = vector.multi_reduction <add>, %12, %cst_11 [0] : vector<64x2xf32> to vector<2xf32>
    %14 = vector.shape_cast %13 : vector<2xf32> to vector<1x2xf32>
    %15 = arith.negf %14 : vector<1x2xf32>
    %16 = math.exp %15 : vector<1x2xf32>
    %cst_12 = arith.constant 1.000000e+00 : f32
    %17 = vector.broadcast %cst_12 : f32 to vector<1x2xf32>
    %18 = arith.addf %17, %16 : vector<1x2xf32>
    %19 = arith.divf %17, %18 : vector<1x2xf32>
    %c0_13 = arith.constant 0 : index
    %c0_14 = arith.constant 0 : index
    %20 = vector.load %arg6[%c0_13, %c0_14] : memref<1x2xf32, #tpu.memory_space<vmem>>, vector<1x2xf32>
    tpu.vector_store %arg6[%c0_13, %c0_14], %19 {strides = array<i32>} : memref<1x2xf32, #tpu.memory_space<vmem>>, vector<1x2xf32>,
    return
  }
  func.func @transform_0(%arg0: i32) -> (i32, i32) {
    %c0_i32 = arith.constant 0 : i32
    %c0_i32_0 = arith.constant 0 : i32
    %c0_i32_1 = arith.constant 0 : i32
    return %c0_i32, %c0_i32_0 : i32, i32
  }
  func.func @transform_1(%arg0: i32) -> (i32, i32) {
    %c0_i32 = arith.constant 0 : i32
    %c0_i32_0 = arith.constant 0 : i32
    %c0_i32_1 = arith.constant 0 : i32
    return %c0_i32, %c0_i32_0 : i32, i32
  }
  func.func @transform_2(%arg0: i32) -> (i32, i32) {
    %c0_i32 = arith.constant 0 : i32
    %c0_i32_0 = arith.constant 0 : i32
    %c0_i32_1 = arith.constant 0 : i32
    return %c0_i32, %c0_i32_0 : i32, i32
  }
  func.func @transform_3(%arg0: i32) -> (i32, i32) {
    %c0_i32 = arith.constant 0 : i32
    %c0_i32_0 = arith.constant 0 : i32
    %c0_i32_1 = arith.constant 0 : i32
    return %c0_i32, %c0_i32_0 : i32, i32
  }
  func.func @transform_4(%arg0: i32) -> (i32, i32) {
    %c0_i32 = arith.constant 0 : i32
    %c0_i32_0 = arith.constant 0 : i32
    %c0_i32_1 = arith.constant 0 : i32
    return %c0_i32, %c0_i32_0 : i32, i32
  }
  func.func @transform_5(%arg0: i32) -> (i32, i32) {
    %c0_i32 = arith.constant 0 : i32
    %c0_i32_0 = arith.constant 0 : i32
    %c0_i32_1 = arith.constant 0 : i32
    return %c0_i32, %c0_i32_0 : i32, i32
  }
}

</mosaic_0001>

<bundles_post_ra>
// kernel: discriminator_forward.3
= control target key start
LH: loop header
LB: loop body
LE: loop exit
PB: predicated region body
PF: predicated region fallthrough
CT: control target
= control target key end

     0   :  { %s892_s12 = smov 0   ;;  %s894_s13 = smov 0   ;;  %s1080_s0 = inlined_call_operand.vmem [shape: bf16[48,2048], index: 0, kind: input, shape index: {}]   ;;  %s1081_s1 = inlined_call_operand.vmem [shape: bf16[16,48], index: 1, kind: input, shape index: {}]   ;;  %s1082_s2 = inlined_call_operand.vmem [shape: f32[16,1], index: 2, kind: input, shape index: {}]   ;;  %s1083_s3 = inlined_call_operand.vmem [shape: bf16[16,2048], index: 3, kind: output, shape index: {}]  }
   0x1   :  { %s896_s14 = smov 0  }
   0x2 LB: > { %s758_s15 = sadd.s32 4294967295, %s869_s14   ;;  %s909_s16 = sadd.s32 1, %s869_s14   ;;  %s869_s14 = sphi %s896_s14, %s1087_s14   ;;  %s865_s13 = sphi %s894_s13, %s1086_s13   ;;  %s861_s12 = sphi %s892_s12, %s1085_s12  }
   0x3   : > { %s17_s17 = ssub.s32 %s869_s14, %s909_s16  ;;  %s20_s18 = sadd.s32 1, %s865_s13 }
   0x4   : > { %p18_p0 = scmp.eq.s32.totalorder %s17_s17, 0  ;;  %p27_p1 = scmp.ne.s32.totalorder %s865_s13, %s861_s12 }
   0x5   : > { %p28_p2 = scmp.eq.s32.totalorder %s869_s14, 0  ;;  %p99_p3 = scmp.eq.s32.totalorder %s758_s15, 1 }
   0x6   : > { %s920_s19 = scalar_select %p18_p0, %s865_s13, %s20_s18  }
   0x7   : > { %p29_p4 = por %p28_p2, %p27_p1  ;;  %p922_p5 = por %p99_p3, %p27_p1 }
   0x8   : > { %p761_p6 = scmp.ge.s32.totalorder %s869_s14, 2 }
   0xa   : > { %127 = sbr.rel (%p761_p6) target bundleno = 34 (0x22), region = 24 }
  0x11   : > { %130 = sbr.rel (!%p29_p4) target bundleno = 34 (0x22), region = 28  ;;  %s132_s21 = sand.u32 (%p29_p4), 1, %s865_s13  }
  0x12   : > { %s808_s22 = sshll.u32 (%p29_p4), %s869_s14, 5  ;;  %s818_s23 = smul.u32 (%p29_p4), 192, %s132_s21 }
  0x13   : > { %s932_s26 = scalar_lea.vmem (%p29_p4), %s1080_s0, %s808_s22 }
  0x14   : > { %v150_v0 = vld [vmem:[%s932_s26] sm:$0xff] (%p29_p4)  ;;  %v152_v1 = vld [vmem:[%s932_s26 + $0x8] sm:$0xff] (%p29_p4)  ;;  %v154_v2 = vld [vmem:[%s932_s26 + $0x10] sm:$0xff] (%p29_p4)  ;;  %s940_s27 = scalar_lea.vmem (%p29_p4), [#allocation2], %s818_s23 }
  0x15   : > { %v156_v3 = vld [vmem:[%s932_s26 + $0x18] sm:$0xff] (%p29_p4)  ;;  %v158_v4 = vld [vmem:[%s932_s26 + $0x40] sm:$0xff] (%p29_p4)  ;;  %v160_v5 = vld [vmem:[%s932_s26 + $0x48] sm:$0xff] (%p29_p4)  ;;  %151 = vst [vmem:[%s940_s27] sm:$0xff] (%p29_p4), %v150_v0 }
  0x16   : > { %153 = vst [vmem:[%s940_s27 + $0x8] sm:$0xff] (%p29_p4), %v152_v1  ;;  %155 = vst [vmem:[%s940_s27 + $0x10] sm:$0xff] (%p29_p4), %v154_v2  ;;  %v162_v6 = vld [vmem:[%s932_s26 + $0x50] sm:$0xff] (%p29_p4)  ;;  %v164_v7 = vld [vmem:[%s932_s26 + $0x58] sm:$0xff] (%p29_p4) }
  0x17   : > { %157 = vst [vmem:[%s940_s27 + $0x18] sm:$0xff] (%p29_p4), %v156_v3  ;;  %159 = vst [vmem:[%s940_s27 + $0x20] sm:$0xff] (%p29_p4), %v158_v4  ;;  %v166_v8 = vld [vmem:[%s932_s26 + $0x80] sm:$0xff] (%p29_p4)  ;;  %v168_v9 = vld [vmem:[%s932_s26 + $0x88] sm:$0xff] (%p29_p4) }
  0x18   : > { %161 = vst [vmem:[%s940_s27 + $0x28] sm:$0xff] %v160_v5  ;;  %163 = vst [vmem:[%s940_s27 + $0x30] sm:$0xff] %v162_v6  ;;  %v170_v10 = vld [vmem:[%s932_s26 + $0x90] sm:$0xff]  ;;  %v172_v11 = vld [vmem:[%s932_s26 + $0x98] sm:$0xff] }
  0x19   : > { %165 = vst [vmem:[%s940_s27 + $0x38] sm:$0xff] %v164_v7  ;;  %167 = vst [vmem:[%s940_s27 + $0x40] sm:$0xff] %v166_v8  ;;  %v174_v12 = vld [vmem:[%s932_s26 + $0xc0] sm:$0xff]  ;;  %v176_v13 = vld [vmem:[%s932_s26 + $0xc8] sm:$0xff] }
  0x1a   : > { %169 = vst [vmem:[%s940_s27 + $0x48] sm:$0xff] %v168_v9  ;;  %171 = vst [vmem:[%s940_s27 + $0x50] sm:$0xff] %v170_v10  ;;  %v178_v14 = vld [vmem:[%s932_s26 + $0xd0] sm:$0xff]  ;;  %v180_v15 = vld [vmem:[%s932_s26 + $0xd8] sm:$0xff] }
  0x1b   : > { %173 = vst [vmem:[%s940_s27 + $0x58] sm:$0xff] %v172_v11  ;;  %175 = vst [vmem:[%s940_s27 + $0x60] sm:$0xff] %v174_v12  ;;  %v182_v16 = vld [vmem:[%s932_s26 + $0x100] sm:$0xff]  ;;  %v184_v17 = vld [vmem:[%s932_s26 + $0x108] sm:$0xff] }
  0x1c   : > { %177 = vst [vmem:[%s940_s27 + $0x68] sm:$0xff] %v176_v13  ;;  %179 = vst [vmem:[%s940_s27 + $0x70] sm:$0xff] %v178_v14  ;;  %v186_v18 = vld [vmem:[%s932_s26 + $0x110] sm:$0xff]  ;;  %v188_v19 = vld [vmem:[%s932_s26 + $0x118] sm:$0xff] }
  0x1d   : > { %181 = vst [vmem:[%s940_s27 + $0x78] sm:$0xff] %v180_v15  ;;  %183 = vst [vmem:[%s940_s27 + $0x80] sm:$0xff] %v182_v16  ;;  %v190_v20 = vld [vmem:[%s932_s26 + $0x140] sm:$0xff]  ;;  %v192_v21 = vld [vmem:[%s932_s26 + $0x148] sm:$0xff] }
  0x1e   : > { %185 = vst [vmem:[%s940_s27 + $0x88] sm:$0xff] %v184_v17  ;;  %187 = vst [vmem:[%s940_s27 + $0x90] sm:$0xff] %v186_v18  ;;  %v194_v22 = vld [vmem:[%s932_s26 + $0x150] sm:$0xff]  ;;  %v196_v23 = vld [vmem:[%s932_s26 + $0x158] sm:$0xff] }
  0x1f   : > { %189 = vst [vmem:[%s940_s27 + $0x98] sm:$0xff] %v188_v19  ;;  %191 = vst [vmem:[%s940_s27 + $0xa0] sm:$0xff] %v190_v20 }
  0x20   : > { %193 = vst [vmem:[%s940_s27 + $0xa8] sm:$0xff] %v192_v21  ;;  %195 = vst [vmem:[%s940_s27 + $0xb0] sm:$0xff] %v194_v22 }
  0x21   : > { %197 = vst [vmem:[%s940_s27 + $0xb8] sm:$0xff] %v196_v23 }
  0x22 PF: > { %p764_p7 = scmp.ge.s32.totalorder %s869_s14, 1  ;;  %p202_p8 = scmp.lt.s32.totalorder %s869_s14, 3 }
  0x24   : > { %p203_p9 = pnand %p764_p7, %p202_p8 }
  0x25   : > { %s209_s28 = sand.u32 (!%p203_p9), 1, %s861_s12   ;;  %v871_v24 = vmov (!%p203_p9), 0   ;;  %v260_v25 = vld [vmem:[%s1082_s2] sm:$0xff] (!%p203_p9)  ;;  %v261_v26 = vld [vmem:[%s1082_s2 + $0x8] sm:$0xff] (!%p203_p9)  ;;  %vm397_vm0 = vcmask (!%p203_p9), 392192  }
  0x26   : > { %206 = sbr.rel (%p203_p9) target bundleno = 302 (0x12e), region = 51  ;;  %433 = vmatprep.mubr.bf16.mxu0 (!%p203_p9), %v871_v24  ;;  %476 = vmatprep.mubr.bf16.mxu1 (!%p203_p9), %v871_v24  ;;  %v846_v59 = vld [vmem:[%s1081_s1] sm:$0xff] (!%p203_p9)   ;;  %s765_s10 = sshll.u32 (!%p203_p9), %s209_s28, 6 }
  0x27   : > { %s819_s29 = smul.u32 (!%p203_p9), 192, %s209_s28  ;;  %845 = vset.pattern.permute.xlu0 (!%p203_p9), %v871_v24  ;;  %s1041_s11 = scalar_lea.vmem (!%p203_p9), [#allocation3], %s765_s10 }
  0x28   : > { %264 = vperm.xlu0 (!%p203_p9), %845, %v260_v25  }
  0x29   : > { %s998_s7 = scalar_lea.vmem (!%p203_p9), [#allocation2], %s819_s29 }
  0x2a   : > { %v236_v27 = vld [vmem:[%s998_s7] sm:$0xff] (!%p203_p9)  ;;  %v237_v29 = vld [vmem:[%s998_s7 + $0x8] sm:$0xff] (!%p203_p9)  ;;  %v238_v49 = vld [vmem:[%s998_s7 + $0x10] sm:$0xff] (!%p203_p9) }
  0x2b   : > { %v240_v28 = vld [vmem:[%s998_s7 + $0x20] sm:$0xff] (!%p203_p9)  ;;  %v241_v31 = vld [vmem:[%s998_s7 + $0x28] sm:$0xff] (!%p203_p9)  ;;  %v242_v50 = vld [vmem:[%s998_s7 + $0x30] sm:$0xff] (!%p203_p9) }
  0x2c   : > { %v768_v30 = vcombine.high (!%p203_p9), %v236_v27, %v240_v28  ;;  %v767_v32 = vcombine.low (!%p203_p9), %v236_v27, %v240_v28  ;;  %v244_v33 = vld [vmem:[%s998_s7 + $0x40] sm:$0xff] (!%p203_p9)  ;;  %v770_v35 = vcombine.high (!%p203_p9), %v237_v29, %v241_v31  ;;  %v769_v36 = vcombine.low (!%p203_p9), %v237_v29, %v241_v31  ;;  %v245_v38 = vld [vmem:[%s998_s7 + $0x48] sm:$0xff] (!%p203_p9)  ;;  %269 = vperm.xlu0 (!%p203_p9), %845, %v261_v26   ;;  %v239_v51 = vld [vmem:[%s998_s7 + $0x18] sm:$0xff] (!%p203_p9) }
  0x2d   : > { %v248_v34 = vld [vmem:[%s998_s7 + $0x60] sm:$0xff]  ;;  %v249_v39 = vld [vmem:[%s998_s7 + $0x68] sm:$0xff]  ;;  %v243_v52 = vld [vmem:[%s998_s7 + $0x38] sm:$0xff]  ;;  %v772_v55 = vcombine.high %v238_v49, %v242_v50  ;;  %v771_v62 = vcombine.low %v238_v49, %v242_v50  ;;  %s817_s12 = sshll.u32 (%p922_p5), %s758_s15, 5 }
  0x2e   : > { %v776_v37 = vcombine.high %v244_v33, %v248_v34  ;;  %v252_v40 = vld [vmem:[%s998_s7 + $0x80] sm:$0xff]  ;;  %401 = vmatprep.subr.bf16.mxu0 %v768_v30  ;;  %v778_v41 = vcombine.high %v245_v38, %v249_v39  ;;  %v253_v43 = vld [vmem:[%s998_s7 + $0x88] sm:$0xff]  ;;  %444 = vmatprep.subr.bf16.mxu1 %v770_v35  ;;  %v775_v45 = vcombine.low %v244_v33, %v248_v34  ;;  %v246_v57 = vld [vmem:[%s998_s7 + $0x50] sm:$0xff]  ;;  %s670_s21 = scalar_lea.vmem (%p922_p5), %s1083_s3, %s817_s12 }
  0x2f   : > { %v256_v42 = vld [vmem:[%s998_s7 + $0xa0] sm:$0xff]  ;;  %v257_v44 = vld [vmem:[%s998_s7 + $0xa8] sm:$0xff]  ;;  %402 = vmatpush1.bf16.msra.mxu0 %v767_v32  ;;  %445 = vmatpush1.bf16.msra.mxu1 %v769_v36  ;;  %v777_v46 = vcombine.low %v245_v38, %v249_v39  ;;  %v774_v56 = vcombine.high %v239_v51, %v243_v52  ;;  %v250_v58 = vld [vmem:[%s998_s7 + $0x70] sm:$0xff]  ;;  %v773_v63 = vcombine.low %v239_v51, %v243_v52 }
  0x30   : > { %403 = vmatprep.subr.bf16.mxu0 %v776_v37  ;;  %v784_v47 = vcombine.high %v252_v40, %v256_v42  ;;  %446 = vmatprep.subr.bf16.mxu1 %v778_v41  ;;  %v786_v48 = vcombine.high %v253_v43, %v257_v44  ;;  %v783_v53 = vcombine.low %v252_v40, %v256_v42  ;;  %v247_v60 = vld [vmem:[%s998_s7 + $0x58] sm:$0xff]  ;;  %v254_v2 = vld [vmem:[%s998_s7 + $0x90] sm:$0xff] }
  0x31   : > { %v785_v54 = vcombine.low %v253_v43, %v257_v44  ;;  %v251_v61 = vld [vmem:[%s998_s7 + $0x78] sm:$0xff]  ;;  %v780_v0 = vcombine.high %v246_v57, %v250_v58  ;;  %v258_v3 = vld [vmem:[%s998_s7 + $0xb0] sm:$0xff]  ;;  %v779_v6 = vcombine.low %v246_v57, %v250_v58 }
  0x32   : > { %v782_v1 = vcombine.high %v247_v60, %v251_v61  ;;  %v255_v4 = vld [vmem:[%s998_s7 + $0x98] sm:$0xff]  ;;  %v781_v7 = vcombine.low %v247_v60, %v251_v61  ;;  %v788_v8 = vcombine.high %v254_v2, %v258_v3  ;;  %v787_v10 = vcombine.low %v254_v2, %v258_v3 }
  0x33   : > { %404 = vmatpush1.bf16.msra.mxu0 %v775_v45  ;;  %447 = vmatpush1.bf16.msra.mxu1 %v777_v46  ;;  %v259_v5 = vld [vmem:[%s998_s7 + $0xb8] sm:$0xff] }
  0x34   : > { %405 = vmatprep.subr.bf16.mxu0 %v784_v47  ;;  %448 = vmatprep.subr.bf16.mxu1 %v786_v48  ;;  %v790_v9 = vcombine.high %v255_v4, %v259_v5  ;;  %v789_v11 = vcombine.low %v255_v4, %v259_v5 }
  0x37   : > { %406 = vmatpush1.bf16.msra.mxu0 %v783_v53  ;;  %449 = vmatpush1.bf16.msra.mxu1 %v785_v54 }
  0x38   : > { %487 = vmatprep.subr.bf16.mxu0 %v772_v55  ;;  %530 = vmatprep.subr.bf16.mxu1 %v774_v56 }
  0x3a   : > { %791 = vmatmul.mubr.msk.bf16.vlgmr.msra.gmra.mrb[0].mxu0 %vm397_vm0, %v846_v59  ;;  %792 = vmatmul.mubr.msk.bf16.vlgmr.msra.gmra.mrb[0].mxu1 %vm397_vm0, %v846_v59 }
  0x3b   : > { %488 = vmatpush1.bf16.msra.mxu0 %v771_v62  ;;  %531 = vmatpush1.bf16.msra.mxu1 %v773_v63 }
  0x3c   : > { %489 = vmatprep.subr.bf16.mxu0 %v780_v0  ;;  %532 = vmatprep.subr.bf16.mxu1 %v782_v1 }
  0x3d   : > { %519 = vmatprep.mubr.bf16.mxu0 %v871_v24  ;;  %562 = vmatprep.mubr.bf16.mxu1 %v871_v24 }
  0x3f   : > { %490 = vmatpush1.bf16.msra.mxu0 %v779_v6  ;;  %533 = vmatpush1.bf16.msra.mxu1 %v781_v7 }
  0x40   : > { %491 = vmatprep.subr.bf16.mxu0 %v788_v8  ;;  %534 = vmatprep.subr.bf16.mxu1 %v790_v9 }
  0x43   : > { %492 = vmatpush1.bf16.msra.mxu0 %v787_v10  ;;  %535 = vmatpush1.bf16.msra.mxu1 %v789_v11 }
  0x46   : > { %793 = vmatmul.mubr.msk.bf16.vlgmr.msra.gmra.mrb[4].mxu0 %vm397_vm0, %v846_v59  ;;  %794 = vmatmul.mubr.msk.bf16.vlgmr.msra.gmra.mrb[4].mxu1 %vm397_vm0, %v846_v59 }
  0xa7   : > { %v265_v12 = vpop.permute.xlu0 %264 }
  0xab   : > { %v1033_v14 = vpop.permute.xlu0 %269 }
 0x10d   : > { %v435_v13 = vpop.f32.mrb[0].mxu0  ;;  %v478_v16 = vpop.f32.mrb[0].mxu1 }
 0x10e   : > { %v436_v15 = vadd.f32 %v435_v13, %v265_v12  ;;  %v437_v17 = vpop.f32.mrb[1].mxu0  ;;  %v479_v18 = vadd.f32 %v478_v16, %v265_v12  ;;  %v480_v20 = vpop.f32.mrb[1].mxu1 }
 0x10f   : > { %v438_v19 = vadd.f32 %v437_v17, %v265_v12  ;;  %v439_v21 = vpop.f32.mrb[2].mxu0  ;;  %v481_v23 = vadd.f32 %v480_v20, %v265_v12  ;;  %v482_v25 = vpop.f32.mrb[2].mxu1 }
 0x110   : > { %v573_v22 = vmul.f32 0.2, %v436_v15  ;;  %v440_v24 = vadd.f32 %v439_v21, %v1033_v14  ;;  %v441_v26 = vpop.f32.mrb[3].mxu0  ;;  %v575_v27 = vmul.f32 0.2, %v479_v18  ;;  %v483_v29 = vadd.f32 %v482_v25, %v1033_v14  ;;  %v484_v31 = vpop.f32.mrb[3].mxu1 }
 0x111   : > { %v574_v28 = vmul.f32 0.2, %v438_v19  ;;  %v442_v30 = vadd.f32 %v441_v26, %v1033_v14  ;;  %v576_v33 = vmul.f32 0.2, %v481_v23  ;;  %v485_v35 = vadd.f32 %v484_v31, %v1033_v14 }
 0x112   : > { %v589_v32 = vmax.f32 %v436_v15, %v573_v22  ;;  %v581_v34 = vmul.f32 0.2, %v440_v24  ;;  %v591_v36 = vmax.f32 %v479_v18, %v575_v27  ;;  %v583_v38 = vmul.f32 0.2, %v483_v29 }
 0x113   : > { %v590_v37 = vmax.f32 %v438_v19, %v574_v28  ;;  %v582_v39 = vmul.f32 0.2, %v442_v30  ;;  %v592_v40 = vmax.f32 %v481_v23, %v576_v33  ;;  %v584_v42 = vmul.f32 0.2, %v485_v35 }
 0x114   : > { %v597_v41 = vmax.f32 %v440_v24, %v581_v34  ;;  %v599_v44 = vmax.f32 %v483_v29, %v583_v38 }
 0x115   : > { %v809_v43 = vpack.c.bf16 %v590_v37, %v589_v32  ;;  %v598_v45 = vmax.f32 %v442_v30, %v582_v39  ;;  %v810_v46 = vpack.c.bf16 %v592_v40, %v591_v36  ;;  %v600_v47 = vmax.f32 %v485_v35, %v584_v42 }
 0x117   : > { %653 = vst [vmem:[%s1041_s11] sm:$0xff] %v809_v43  ;;  %v813_v48 = vpack.c.bf16 %v598_v45, %v597_v41  ;;  %654 = vst [vmem:[%s1041_s11 + $0x8] sm:$0xff] %v810_v46  ;;  %v814_v49 = vpack.c.bf16 %v600_v47, %v599_v44 }
 0x119   : > { %657 = vst [vmem:[%s1041_s11 + $0x20] sm:$0xff] %v813_v48  ;;  %v521_v50 = vpop.f32.mrb[4].mxu0  ;;  %658 = vst [vmem:[%s1041_s11 + $0x28] sm:$0xff] %v814_v49  ;;  %v564_v52 = vpop.f32.mrb[4].mxu1 }
 0x11a   : > { %v522_v51 = vadd.f32 %v521_v50, %v265_v12  ;;  %v523_v53 = vpop.f32.mrb[5].mxu0  ;;  %v565_v54 = vadd.f32 %v564_v52, %v265_v12  ;;  %v566_v56 = vpop.f32.mrb[5].mxu1 }
 0x11b   : > { %v524_v55 = vadd.f32 %v523_v53, %v265_v12  ;;  %v525_v57 = vpop.f32.mrb[6].mxu0  ;;  %v567_v59 = vadd.f32 %v566_v56, %v265_v12  ;;  %v568_v61 = vpop.f32.mrb[6].mxu1 }
 0x11c   : > { %v577_v58 = vmul.f32 0.2, %v522_v51  ;;  %v526_v60 = vadd.f32 %v525_v57, %v1033_v14  ;;  %v527_v62 = vpop.f32.mrb[7].mxu0  ;;  %v579_v63 = vmul.f32 0.2, %v565_v54  ;;  %v569_v1 = vadd.f32 %v568_v61, %v1033_v14  ;;  %v570_v3 = vpop.f32.mrb[7].mxu1 }
 0x11d   : > { %v578_v0 = vmul.f32 0.2, %v524_v55  ;;  %v528_v2 = vadd.f32 %v527_v62, %v1033_v14  ;;  %v580_v5 = vmul.f32 0.2, %v567_v59  ;;  %v571_v7 = vadd.f32 %v570_v3, %v1033_v14 }
 0x11e   : > { %v593_v4 = vmax.f32 %v522_v51, %v577_v58  ;;  %v585_v6 = vmul.f32 0.2, %v526_v60  ;;  %v595_v8 = vmax.f32 %v565_v54, %v579_v63  ;;  %v587_v10 = vmul.f32 0.2, %v569_v1  ;;  %v683_v14 = vld [vmem:[%s1041_s11] sm:$0xff] (%p922_p5)  ;;  %v685_v23 = vld [vmem:[%s1041_s11 + $0x8] sm:$0xff] (%p922_p5) }
 0x11f   : > { %v594_v9 = vmax.f32 %v524_v55, %v578_v0  ;;  %v586_v11 = vmul.f32 0.2, %v528_v2  ;;  %v596_v12 = vmax.f32 %v567_v59, %v580_v5  ;;  %v588_v15 = vmul.f32 0.2, %v571_v7  ;;  %667 = sbr.rel (!%p922_p5) target bundleno = 302 (0x12e), region = 59  ;;  %684 = vst [vmem:[%s670_s21] sm:$0xff] (%p922_p5), %v683_v14  ;;  %686 = vst [vmem:[%s670_s21 + $0x8] sm:$0xff] (%p922_p5), %v685_v23 }
 0x120   : > { %v601_v13 = vmax.f32 %v526_v60, %v585_v6  ;;  %v603_v17 = vmax.f32 %v569_v1, %v587_v10  ;;  %v691_v26 = vld [vmem:[%s1041_s11 + $0x20] sm:$0xff] (%p922_p5)  ;;  %v693_v27 = vld [vmem:[%s1041_s11 + $0x28] sm:$0xff] (%p922_p5) }
 0x121   : > { %v811_v16 = vpack.c.bf16 %v594_v9, %v593_v4  ;;  %v602_v18 = vmax.f32 %v528_v2, %v586_v11  ;;  %v812_v19 = vpack.c.bf16 %v596_v12, %v595_v8  ;;  %v604_v20 = vmax.f32 %v571_v7, %v588_v15  ;;  %692 = vst [vmem:[%s670_s21 + $0x40] sm:$0xff] (%p922_p5), %v691_v26 }
 0x122   : > { %694 = vst [vmem:[%s670_s21 + $0x48] sm:$0xff] (%p922_p5), %v693_v27 }
 0x123   : > { %655 = vst [vmem:[%s1041_s11 + $0x10] sm:$0xff] %v811_v16  ;;  %v815_v21 = vpack.c.bf16 %v602_v18, %v601_v13  ;;  %656 = vst [vmem:[%s1041_s11 + $0x18] sm:$0xff] %v812_v19  ;;  %v816_v22 = vpack.c.bf16 %v604_v20, %v603_v17 }
 0x125   : > { %659 = vst [vmem:[%s1041_s11 + $0x30] sm:$0xff] %v815_v21  ;;  %660 = vst [vmem:[%s1041_s11 + $0x38] sm:$0xff] %v816_v22 }
 0x12a   : > { %v687_v24 = vld [vmem:[%s1041_s11 + $0x10] sm:$0xff]  ;;  %v689_v25 = vld [vmem:[%s1041_s11 + $0x18] sm:$0xff] }
 0x12b   : > { %688 = vst [vmem:[%s670_s21 + $0x10] sm:$0xff] %v687_v24  ;;  %690 = vst [vmem:[%s670_s21 + $0x18] sm:$0xff] %v689_v25 }
 0x12c   : > { %v695_v28 = vld [vmem:[%s1041_s11 + $0x30] sm:$0xff]  ;;  %v697_v29 = vld [vmem:[%s1041_s11 + $0x38] sm:$0xff] }
 0x12d   : > { %696 = vst [vmem:[%s670_s21 + $0x50] sm:$0xff] %v695_v28  ;;  %698 = vst [vmem:[%s670_s21 + $0x58] sm:$0xff] %v697_v29 }
 0x12e PF: > { %p10_p10 = scmp.ge.s32.totalorder %s909_s16, 4   ;;  %s1085_s12 = smov %s865_s13 }
 0x12f   : > { %s1086_s13 = smov %s920_s19  ;;  %s1087_s14 = smov %s909_s16 }
 0x130   :  { %12 = sbr.rel (!%p10_p10) target bundleno = 2 (0x2), region = 113 }

// kernel: discriminator_forward.4
= control target key start
LH: loop header
LB: loop body
LE: loop exit
PB: predicated region body
PF: predicated region fallthrough
CT: control target
= control target key end

     0   :  { %s992_s12 = smov 0   ;;  %s994_s13 = smov 0   ;;  %s1182_s0 = inlined_call_operand.vmem [shape: bf16[256,512], index: 0, kind: input, shape index: {}]   ;;  %s1183_s1 = inlined_call_operand.vmem [shape: bf16[32,256], index: 1, kind: input, shape index: {}]   ;;  %s1184_s2 = inlined_call_operand.vmem [shape: f32[32,1], index: 2, kind: input, shape index: {}]   ;;  %s1185_s3 = inlined_call_operand.vmem [shape: bf16[32,512], index: 3, kind: output, shape index: {}]  }
   0x1   :  { %s996_s14 = smov 0  }
   0x2 LB: > { %s773_s15 = sadd.s32 4294967295, %s969_s14   ;;  %s1009_s16 = sadd.s32 1, %s969_s14   ;;  %s969_s14 = sphi %s996_s14, %s1189_s14   ;;  %s965_s13 = sphi %s994_s13, %s1188_s13   ;;  %s961_s12 = sphi %s992_s12, %s1187_s12  }
   0x3   : > { %s17_s17 = ssub.s32 %s969_s14, %s1009_s16  ;;  %s20_s18 = sadd.s32 1, %s965_s13 }
   0x4   : > { %p18_p0 = scmp.eq.s32.totalorder %s17_s17, 0  ;;  %p27_p1 = scmp.ne.s32.totalorder %s965_s13, %s961_s12 }
   0x5   : > { %p28_p2 = scmp.eq.s32.totalorder %s969_s14, 0  ;;  %p99_p3 = scmp.eq.s32.totalorder %s773_s15, 1 }
   0x6   : > { %s1020_s19 = scalar_select %p18_p0, %s965_s13, %s20_s18  }
   0x7   : > { %p29_p4 = por %p28_p2, %p27_p1  ;;  %p1022_p5 = por %p99_p3, %p27_p1 }
   0x8   : > { %p776_p6 = scmp.ge.s32.totalorder %s969_s14, 2 }
   0xa   : > { %127 = sbr.rel (%p776_p6) target bundleno = 37 (0x25), region = 24 }
  0x11   : > { %130 = sbr.rel (!%p29_p4) target bundleno = 37 (0x25), region = 28  ;;  %s132_s21 = sand.u32 (%p29_p4), 1, %s965_s13  }
  0x12   : > { %s828_s22 = sshll.u32 (%p29_p4), %s969_s14, 3  ;;  %s777_s23 = sshll.u32 (%p29_p4), %s132_s21, 8 }
  0x13   : > { %s1032_s26 = scalar_lea.vmem (%p29_p4), %s1182_s0, %s828_s22  ;;  %s1037_s27 = scalar_lea.vmem (%p29_p4), [#allocation2], %s777_s23 }
  0x14   : > { %v227_v0 = vld [vmem:[%s1032_s26] sm:$0xff] (%p29_p4)  ;;  %v229_v1 = vld [vmem:[%s1032_s26 + $0x10] sm:$0xff] (%p29_p4) }
  0x15   : > { %v231_v2 = vld [vmem:[%s1032_s26 + $0x20] sm:$0xff] (%p29_p4)  ;;  %228 = vst [vmem:[%s1037_s27] sm:$0xff] (%p29_p4), %v227_v0  ;;  %230 = vst [vmem:[%s1037_s27 + $0x8] sm:$0xff] (%p29_p4), %v229_v1  ;;  %v233_v3 = vld [vmem:[%s1032_s26 + $0x30] sm:$0xff] (%p29_p4) }
  0x16   : > { %232 = vst [vmem:[%s1037_s27 + $0x10] sm:$0xff] (%p29_p4), %v231_v2  ;;  %v235_v4 = vld [vmem:[%s1032_s26 + $0x40] sm:$0xff] (%p29_p4)  ;;  %v237_v5 = vld [vmem:[%s1032_s26 + $0x50] sm:$0xff] (%p29_p4)  ;;  %234 = vst [vmem:[%s1037_s27 + $0x18] sm:$0xff] (%p29_p4), %v233_v3 }
  0x17   : > { %236 = vst [vmem:[%s1037_s27 + $0x20] sm:$0xff] (%p29_p4), %v235_v4  ;;  %238 = vst [vmem:[%s1037_s27 + $0x28] sm:$0xff] (%p29_p4), %v237_v5  ;;  %v239_v6 = vld [vmem:[%s1032_s26 + $0x60] sm:$0xff] (%p29_p4)  ;;  %v241_v7 = vld [vmem:[%s1032_s26 + $0x70] sm:$0xff] (%p29_p4) }
  0x18   : > { %v243_v8 = vld [vmem:[%s1032_s26 + $0x80] sm:$0xff]  ;;  %240 = vst [vmem:[%s1037_s27 + $0x30] sm:$0xff] %v239_v6  ;;  %242 = vst [vmem:[%s1037_s27 + $0x38] sm:$0xff] %v241_v7  ;;  %v245_v9 = vld [vmem:[%s1032_s26 + $0x90] sm:$0xff] }
  0x19   : > { %244 = vst [vmem:[%s1037_s27 + $0x40] sm:$0xff] %v243_v8  ;;  %v247_v10 = vld [vmem:[%s1032_s26 + $0xa0] sm:$0xff]  ;;  %v249_v11 = vld [vmem:[%s1032_s26 + $0xb0] sm:$0xff]  ;;  %246 = vst [vmem:[%s1037_s27 + $0x48] sm:$0xff] %v245_v9 }
  0x1a   : > { %248 = vst [vmem:[%s1037_s27 + $0x50] sm:$0xff] %v247_v10  ;;  %250 = vst [vmem:[%s1037_s27 + $0x58] sm:$0xff] %v249_v11  ;;  %v251_v12 = vld [vmem:[%s1032_s26 + $0xc0] sm:$0xff]  ;;  %v253_v13 = vld [vmem:[%s1032_s26 + $0xd0] sm:$0xff] }
  0x1b   : > { %v255_v14 = vld [vmem:[%s1032_s26 + $0xe0] sm:$0xff]  ;;  %252 = vst [vmem:[%s1037_s27 + $0x60] sm:$0xff] %v251_v12  ;;  %254 = vst [vmem:[%s1037_s27 + $0x68] sm:$0xff] %v253_v13  ;;  %v257_v15 = vld [vmem:[%s1032_s26 + $0xf0] sm:$0xff] }
  0x1c   : > { %256 = vst [vmem:[%s1037_s27 + $0x70] sm:$0xff] %v255_v14  ;;  %v259_v16 = vld [vmem:[%s1032_s26 + $0x100] sm:$0xff]  ;;  %v261_v17 = vld [vmem:[%s1032_s26 + $0x110] sm:$0xff]  ;;  %258 = vst [vmem:[%s1037_s27 + $0x78] sm:$0xff] %v257_v15 }
  0x1d   : > { %260 = vst [vmem:[%s1037_s27 + $0x80] sm:$0xff] %v259_v16  ;;  %262 = vst [vmem:[%s1037_s27 + $0x88] sm:$0xff] %v261_v17  ;;  %v263_v18 = vld [vmem:[%s1032_s26 + $0x120] sm:$0xff]  ;;  %v265_v19 = vld [vmem:[%s1032_s26 + $0x130] sm:$0xff] }
  0x1e   : > { %v267_v20 = vld [vmem:[%s1032_s26 + $0x140] sm:$0xff]  ;;  %264 = vst [vmem:[%s1037_s27 + $0x90] sm:$0xff] %v263_v18  ;;  %266 = vst [vmem:[%s1037_s27 + $0x98] sm:$0xff] %v265_v19  ;;  %v269_v21 = vld [vmem:[%s1032_s26 + $0x150] sm:$0xff] }
  0x1f   : > { %268 = vst [vmem:[%s1037_s27 + $0xa0] sm:$0xff] %v267_v20  ;;  %v271_v22 = vld [vmem:[%s1032_s26 + $0x160] sm:$0xff]  ;;  %v273_v23 = vld [vmem:[%s1032_s26 + $0x170] sm:$0xff]  ;;  %270 = vst [vmem:[%s1037_s27 + $0xa8] sm:$0xff] %v269_v21 }
  0x20   : > { %272 = vst [vmem:[%s1037_s27 + $0xb0] sm:$0xff] %v271_v22  ;;  %274 = vst [vmem:[%s1037_s27 + $0xb8] sm:$0xff] %v273_v23  ;;  %v275_v24 = vld [vmem:[%s1032_s26 + $0x180] sm:$0xff]  ;;  %v277_v25 = vld [vmem:[%s1032_s26 + $0x190] sm:$0xff] }
  0x21   : > { %v279_v26 = vld [vmem:[%s1032_s26 + $0x1a0] sm:$0xff]  ;;  %276 = vst [vmem:[%s1037_s27 + $0xc0] sm:$0xff] %v275_v24  ;;  %278 = vst [vmem:[%s1037_s27 + $0xc8] sm:$0xff] %v277_v25  ;;  %v281_v27 = vld [vmem:[%s1032_s26 + $0x1b0] sm:$0xff] }
  0x22   : > { %280 = vst [vmem:[%s1037_s27 + $0xd0] sm:$0xff] %v279_v26  ;;  %v283_v28 = vld [vmem:[%s1032_s26 + $0x1c0] sm:$0xff]  ;;  %v285_v29 = vld [vmem:[%s1032_s26 + $0x1d0] sm:$0xff]  ;;  %282 = vst [vmem:[%s1037_s27 + $0xd8] sm:$0xff] %v281_v27 }
  0x23   : > { %284 = vst [vmem:[%s1037_s27 + $0xe0] sm:$0xff] %v283_v28  ;;  %286 = vst [vmem:[%s1037_s27 + $0xe8] sm:$0xff] %v285_v29  ;;  %v287_v30 = vld [vmem:[%s1032_s26 + $0x1e0] sm:$0xff]  ;;  %v289_v31 = vld [vmem:[%s1032_s26 + $0x1f0] sm:$0xff] }
  0x24   : > { %288 = vst [vmem:[%s1037_s27 + $0xf0] sm:$0xff] %v287_v30  ;;  %290 = vst [vmem:[%s1037_s27 + $0xf8] sm:$0xff] %v289_v31 }
  0x25 PF: > { %p780_p7 = scmp.ge.s32.totalorder %s969_s14, 1  ;;  %p295_p8 = scmp.lt.s32.totalorder %s969_s14, 3 }
  0x27   : > { %p296_p9 = pnand %p780_p7, %p295_p8 }
  0x28   : > { %s302_s28 = sand.u32 (!%p296_p9), 1, %s961_s12   ;;  %v943_v32 = vld [vmem:[%s1183_s1 + $0x4] ss:$8 sps:$4 sm:$0xff] (!%p296_p9)   ;;  %v971_v33 = vmov (!%p296_p9), 0   ;;  %v946_v34 = vld [vmem:[%s1183_s1 + $0x14] ss:$8 sps:$4 sm:$0xff] (!%p296_p9)  }
  0x29   : > { %299 = sbr.rel (%p296_p9) target bundleno = 340 (0x154), region = 66  ;;  %s781_s29 = sshll.u32 (!%p296_p9), %s302_s28, 8  ;;  %892 = vset.pattern.permute.xlu1 (!%p296_p9), %v971_v33  ;;  %891 = vset.pattern.permute.xlu0 (!%p296_p9), %v971_v33  ;;  %v364_v35 = vld [vmem:[%s1184_s2 + $0x10] sm:$0xff] (!%p296_p9)  ;;  %v362_v49 = vld [vmem:[%s1184_s2] sm:$0xff] (!%p296_p9)  ;;  %v365_v50 = vld [vmem:[%s1184_s2 + $0x18] sm:$0xff] (!%p296_p9) }
  0x2a   : > { %s1114_s9 = scalar_lea.vmem (!%p296_p9), [#allocation2], %s781_s29  ;;  %598 = vmatprep.mubr.bf16.mxu0 (!%p296_p9), %v943_v32  ;;  %378 = vperm.xlu1 (!%p296_p9), %892, %v364_v35   ;;  %v363_v52 = vld [vmem:[%s1184_s2 + $0x8] sm:$0xff] (!%p296_p9)  ;;  %v944_v8 = vld [vmem:[%s1183_s1 + $0x10] ss:$8 sps:$4 sm:$0xff] (!%p296_p9)   ;;  %s782_s27 = sshll.u32 (!%p296_p9), %s302_s28, 5 }
  0x2b   : > { %v893_v36 = vld [vmem:[%s1114_s9 + $0x4] ss:$8 sps:$4 sm:$0xff] (!%p296_p9)   ;;  %v895_v37 = vld [vmem:[%s1114_s9] ss:$8 sps:$4 sm:$0xff] (!%p296_p9)   ;;  %608 = vmatprep.mubr.bf16.mxu1 (!%p296_p9), %v946_v34  ;;  %v896_v38 = vld [vmem:[%s1114_s9 + $0x14] ss:$8 sps:$4 sm:$0xff] (!%p296_p9)   ;;  %368 = vperm.xlu0 (!%p296_p9), %891, %v362_v49  }
  0x2c   : > { %566 = vmatprep.subr.bf16.mxu0 (!%p296_p9), %v893_v36  ;;  %834 = vmatprep.subr.bf16.mxu1 (!%p296_p9), %v893_v36  ;;  %v898_v39 = vld [vmem:[%s1114_s9 + $0x10] ss:$8 sps:$4 sm:$0xff] (!%p296_p9)   ;;  %v899_v40 = vld [vmem:[%s1114_s9 + $0x24] ss:$8 sps:$4 sm:$0xff] (!%p296_p9)   ;;  %v901_v41 = vld [vmem:[%s1114_s9 + $0x20] ss:$8 sps:$4 sm:$0xff] (!%p296_p9)  }
  0x2d   : > { %567 = vmatpush1.bf16.msra.mxu0 (!%p296_p9), %v895_v37  ;;  %850 = vmatpush1.bf16.msra.mxu1 (!%p296_p9), %v895_v37  ;;  %v902_v42 = vld [vmem:[%s1114_s9 + $0x34] ss:$8 sps:$4 sm:$0xff] (!%p296_p9)   ;;  %v904_v43 = vld [vmem:[%s1114_s9 + $0x30] ss:$8 sps:$4 sm:$0xff] (!%p296_p9)   ;;  %v905_v44 = vld [vmem:[%s1114_s9 + $0x44] ss:$8 sps:$4 sm:$0xff] (!%p296_p9)  }
  0x2e   : > { %568 = vmatprep.subr.bf16.mxu0 (!%p296_p9), %v896_v38  ;;  %835 = vmatprep.subr.bf16.mxu1 (!%p296_p9), %v896_v38  ;;  %v907_v45 = vld [vmem:[%s1114_s9 + $0x40] ss:$8 sps:$4 sm:$0xff] (!%p296_p9)   ;;  %v908_v46 = vld [vmem:[%s1114_s9 + $0x54] ss:$8 sps:$4 sm:$0xff] (!%p296_p9)   ;;  %v910_v47 = vld [vmem:[%s1114_s9 + $0x50] ss:$8 sps:$4 sm:$0xff] (!%p296_p9)  }
  0x2f   : > { %v911_v48 = vld [vmem:[%s1114_s9 + $0x64] ss:$8 sps:$4 sm:$0xff] (!%p296_p9)   ;;  %383 = vperm.xlu1 (!%p296_p9), %892, %v365_v50   ;;  %v913_v51 = vld [vmem:[%s1114_s9 + $0x60] ss:$8 sps:$4 sm:$0xff] (!%p296_p9)   ;;  %v914_v53 = vld [vmem:[%s1114_s9 + $0x74] ss:$8 sps:$4 sm:$0xff] (!%p296_p9)   ;;  %373 = vperm.xlu0 (!%p296_p9), %891, %v363_v52  }
  0x30   : > { %v916_v54 = vld [vmem:[%s1114_s9 + $0x70] ss:$8 sps:$4 sm:$0xff]   ;;  %v917_v55 = vld [vmem:[%s1114_s9 + $0x84] ss:$8 sps:$4 sm:$0xff]   ;;  %v919_v56 = vld [vmem:[%s1114_s9 + $0x80] ss:$8 sps:$4 sm:$0xff]  }
  0x31   : > { %569 = vmatpush1.bf16.msra.mxu0 %v898_v39  ;;  %851 = vmatpush1.bf16.msra.mxu1 %v898_v39  ;;  %v920_v57 = vld [vmem:[%s1114_s9 + $0x94] ss:$8 sps:$4 sm:$0xff]   ;;  %v922_v58 = vld [vmem:[%s1114_s9 + $0x90] ss:$8 sps:$4 sm:$0xff]   ;;  %v923_v59 = vld [vmem:[%s1114_s9 + $0xa4] ss:$8 sps:$4 sm:$0xff]  }
  0x32   : > { %570 = vmatprep.subr.bf16.mxu0 %v899_v40  ;;  %836 = vmatprep.subr.bf16.mxu1 %v899_v40  ;;  %v925_v60 = vld [vmem:[%s1114_s9 + $0xa0] ss:$8 sps:$4 sm:$0xff]   ;;  %v926_v61 = vld [vmem:[%s1114_s9 + $0xb4] ss:$8 sps:$4 sm:$0xff]   ;;  %v928_v62 = vld [vmem:[%s1114_s9 + $0xb0] ss:$8 sps:$4 sm:$0xff]  }
  0x33   : > { %v929_v63 = vld [vmem:[%s1114_s9 + $0xc4] ss:$8 sps:$4 sm:$0xff]   ;;  %v931_v0 = vld [vmem:[%s1114_s9 + $0xc0] ss:$8 sps:$4 sm:$0xff]   ;;  %v932_v1 = vld [vmem:[%s1114_s9 + $0xd4] ss:$8 sps:$4 sm:$0xff]  }
  0x34   : > { %v934_v2 = vld [vmem:[%s1114_s9 + $0xd0] ss:$8 sps:$4 sm:$0xff]   ;;  %v935_v3 = vld [vmem:[%s1114_s9 + $0xe4] ss:$8 sps:$4 sm:$0xff]   ;;  %v937_v4 = vld [vmem:[%s1114_s9 + $0xe0] ss:$8 sps:$4 sm:$0xff]  }
  0x35   : > { %571 = vmatpush1.bf16.msra.mxu0 %v901_v41  ;;  %852 = vmatpush1.bf16.msra.mxu1 %v901_v41  ;;  %v938_v5 = vld [vmem:[%s1114_s9 + $0xf4] ss:$8 sps:$4 sm:$0xff]   ;;  %v940_v6 = vld [vmem:[%s1114_s9 + $0xf0] ss:$8 sps:$4 sm:$0xff]   ;;  %v941_v7 = vld [vmem:[%s1183_s1] ss:$8 sps:$4 sm:$0xff]  }
  0x36   : > { %572 = vmatprep.subr.bf16.mxu0 %v902_v42  ;;  %837 = vmatprep.subr.bf16.mxu1 %v902_v42  ;;  %s323_s12 = scalar_lea.vmem [#allocation3], %s782_s27  ;;  %s833_s28 = sshll.u32 (%p1022_p5), %s773_s15, 3 }
  0x37   : > { %s672_s4 = scalar_lea.vmem (%p1022_p5), %s1185_s3, %s833_s28 }
  0x39   : > { %573 = vmatpush1.bf16.msra.mxu0 %v904_v43  ;;  %853 = vmatpush1.bf16.msra.mxu1 %v904_v43 }
  0x3a   : > { %574 = vmatprep.subr.bf16.mxu0 %v905_v44  ;;  %838 = vmatprep.subr.bf16.mxu1 %v905_v44 }
  0x3d   : > { %575 = vmatpush1.bf16.msra.mxu0 %v907_v45  ;;  %854 = vmatpush1.bf16.msra.mxu1 %v907_v45 }
  0x3e   : > { %576 = vmatprep.subr.bf16.mxu0 %v908_v46  ;;  %839 = vmatprep.subr.bf16.mxu1 %v908_v46 }
  0x41   : > { %577 = vmatpush1.bf16.msra.mxu0 %v910_v47  ;;  %855 = vmatpush1.bf16.msra.mxu1 %v910_v47 }
  0x42   : > { %578 = vmatprep.subr.bf16.mxu0 %v911_v48  ;;  %840 = vmatprep.subr.bf16.mxu1 %v911_v48 }
  0x45   : > { %579 = vmatpush1.bf16.msra.mxu0 %v913_v51  ;;  %856 = vmatpush1.bf16.msra.mxu1 %v913_v51 }
  0x46   : > { %580 = vmatprep.subr.bf16.mxu0 %v914_v53  ;;  %841 = vmatprep.subr.bf16.mxu1 %v914_v53 }
  0x49   : > { %581 = vmatpush1.bf16.msra.mxu0 %v916_v54  ;;  %857 = vmatpush1.bf16.msra.mxu1 %v916_v54 }
  0x4a   : > { %582 = vmatprep.subr.bf16.mxu0 %v917_v55  ;;  %842 = vmatprep.subr.bf16.mxu1 %v917_v55 }
  0x4d   : > { %583 = vmatpush1.bf16.msra.mxu0 %v919_v56  ;;  %858 = vmatpush1.bf16.msra.mxu1 %v919_v56 }
  0x4e   : > { %584 = vmatprep.subr.bf16.mxu0 %v920_v57  ;;  %843 = vmatprep.subr.bf16.mxu1 %v920_v57 }
  0x51   : > { %585 = vmatpush1.bf16.msra.mxu0 %v922_v58  ;;  %859 = vmatpush1.bf16.msra.mxu1 %v922_v58 }
  0x52   : > { %586 = vmatprep.subr.bf16.mxu0 %v923_v59  ;;  %844 = vmatprep.subr.bf16.mxu1 %v923_v59 }
  0x55   : > { %587 = vmatpush1.bf16.msra.mxu0 %v925_v60  ;;  %860 = vmatpush1.bf16.msra.mxu1 %v925_v60 }
  0x56   : > { %588 = vmatprep.subr.bf16.mxu0 %v926_v61  ;;  %845 = vmatprep.subr.bf16.mxu1 %v926_v61 }
  0x59   : > { %589 = vmatpush1.bf16.msra.mxu0 %v928_v62  ;;  %861 = vmatpush1.bf16.msra.mxu1 %v928_v62 }
  0x5a   : > { %590 = vmatprep.subr.bf16.mxu0 %v929_v63  ;;  %846 = vmatprep.subr.bf16.mxu1 %v929_v63 }
  0x5d   : > { %591 = vmatpush1.bf16.msra.mxu0 %v931_v0  ;;  %862 = vmatpush1.bf16.msra.mxu1 %v931_v0 }
  0x5e   : > { %592 = vmatprep.subr.bf16.mxu0 %v932_v1  ;;  %847 = vmatprep.subr.bf16.mxu1 %v932_v1 }
  0x61   : > { %593 = vmatpush1.bf16.msra.mxu0 %v934_v2  ;;  %863 = vmatpush1.bf16.msra.mxu1 %v934_v2 }
  0x62   : > { %594 = vmatprep.subr.bf16.mxu0 %v935_v3  ;;  %848 = vmatprep.subr.bf16.mxu1 %v935_v3 }
  0x65   : > { %595 = vmatpush1.bf16.msra.mxu0 %v937_v4  ;;  %864 = vmatpush1.bf16.msra.mxu1 %v937_v4 }
  0x66   : > { %596 = vmatprep.subr.bf16.mxu0 %v938_v5  ;;  %849 = vmatprep.subr.bf16.mxu1 %v938_v5 }
  0x69   : > { %597 = vmatpush1.bf16.msra.mxu0 %v940_v6  ;;  %865 = vmatpush1.bf16.msra.mxu1 %v940_v6 }
  0x6c   : > { %599 = vmatmul.mubr.bf16.vlgmr.msra.gmra.mrb[0].mxu0 %v941_v7  ;;  %609 = vmatmul.mubr.bf16.vlgmr.msra.gmra.mrb[0].mxu1 %v944_v8 }
  0xa9   : > { %v379_v9 = vpop.permute.xlu1 %378 }
  0xaa   : > { %v369_v10 = vpop.permute.xlu0 %368 }
  0xae   : > { %v384_v11 = vpop.permute.xlu1 %383  ;;  %v374_v12 = vpop.permute.xlu0 %373 }
 0x13f   : > { %v600_v13 = vpop.f32.mrb[0].mxu0  ;;  %v610_v14 = vpop.f32.mrb[0].mxu1 }
 0x140   : > { %v601_v15 = vadd.f32 %v600_v13, %v369_v10  ;;  %v611_v16 = vadd.f32 %v610_v14, %v379_v9  ;;  %v602_v17 = vpop.f32.mrb[1].mxu0  ;;  %v612_v18 = vpop.f32.mrb[1].mxu1 }
 0x141   : > { %v603_v19 = vadd.f32 %v602_v17, %v369_v10  ;;  %v613_v20 = vadd.f32 %v612_v18, %v379_v9  ;;  %v604_v21 = vpop.f32.mrb[2].mxu0  ;;  %v614_v22 = vpop.f32.mrb[2].mxu1 }
 0x142   : > { %v619_v23 = vmul.f32 0.2, %v601_v15  ;;  %v623_v24 = vmul.f32 0.2, %v611_v16  ;;  %v605_v25 = vadd.f32 %v604_v21, %v374_v12  ;;  %v615_v26 = vadd.f32 %v614_v22, %v384_v11  ;;  %v606_v27 = vpop.f32.mrb[3].mxu0  ;;  %v616_v28 = vpop.f32.mrb[3].mxu1 }
 0x143   : > { %v620_v29 = vmul.f32 0.2, %v603_v19  ;;  %v624_v30 = vmul.f32 0.2, %v613_v20  ;;  %v607_v31 = vadd.f32 %v606_v27, %v374_v12  ;;  %v617_v32 = vadd.f32 %v616_v28, %v384_v11 }
 0x144   : > { %v627_v33 = vmax.f32 %v601_v15, %v619_v23  ;;  %v631_v34 = vmax.f32 %v611_v16, %v623_v24  ;;  %v621_v35 = vmul.f32 0.2, %v605_v25  ;;  %v625_v36 = vmul.f32 0.2, %v615_v26 }
 0x145   : > { %v628_v37 = vmax.f32 %v603_v19, %v620_v29  ;;  %v632_v38 = vmax.f32 %v613_v20, %v624_v30  ;;  %v622_v39 = vmul.f32 0.2, %v607_v31  ;;  %v626_v40 = vmul.f32 0.2, %v617_v32  ;;  %669 = sbr.rel (!%p1022_p5) target bundleno = 340 (0x154), region = 74 }
 0x146   : > { %v629_v41 = vmax.f32 %v605_v25, %v621_v35  ;;  %v633_v42 = vmax.f32 %v615_v26, %v625_v36 }
 0x147   : > { %v829_v43 = vpack.c.bf16 %v628_v37, %v627_v33  ;;  %v831_v44 = vpack.c.bf16 %v632_v38, %v631_v34  ;;  %v630_v45 = vmax.f32 %v607_v31, %v622_v39  ;;  %v634_v46 = vmax.f32 %v617_v32, %v626_v40 }
 0x149   : > { %659 = vst [vmem:[%s323_s12] sm:$0xff] %v829_v43  ;;  %661 = vst [vmem:[%s323_s12 + $0x10] sm:$0xff] %v831_v44  ;;  %v830_v47 = vpack.c.bf16 %v630_v45, %v629_v41  ;;  %v832_v48 = vpack.c.bf16 %v634_v46, %v633_v42 }
 0x14b   : > { %660 = vst [vmem:[%s323_s12 + $0x8] sm:$0xff] %v830_v47  ;;  %662 = vst [vmem:[%s323_s12 + $0x18] sm:$0xff] %v832_v48 }
 0x150   : > { %v706_v49 = vld [vmem:[%s323_s12] sm:$0xff]  ;;  %v710_v51 = vld [vmem:[%s323_s12 + $0x10] sm:$0xff] }
 0x151   : > { %707 = vst [vmem:[%s672_s4] sm:$0xff] %v706_v49  ;;  %711 = vst [vmem:[%s672_s4 + $0x20] sm:$0xff] %v710_v51 }
 0x152   : > { %v708_v50 = vld [vmem:[%s323_s12 + $0x8] sm:$0xff]  ;;  %v712_v52 = vld [vmem:[%s323_s12 + $0x18] sm:$0xff] }
 0x153   : > { %709 = vst [vmem:[%s672_s4 + $0x10] sm:$0xff] %v708_v50  ;;  %713 = vst [vmem:[%s672_s4 + $0x30] sm:$0xff] %v712_v52 }
 0x154 PF: > { %p10_p10 = scmp.ge.s32.totalorder %s1009_s16, 4   ;;  %s1187_s12 = smov %s965_s13 }
 0x155   : > { %s1188_s13 = smov %s1020_s19  ;;  %s1189_s14 = smov %s1009_s16 }
 0x156   :  { %12 = sbr.rel (!%p10_p10) target bundleno = 2 (0x2), region = 143 }

// kernel: discriminator_forward.5
= control target key start
LH: loop header
LB: loop body
LE: loop exit
PB: predicated region body
PF: predicated region fallthrough
CT: control target
= control target key end

     0   :  { %v1082_v2 = vmov 0   ;;  %s1374_s0 = inlined_call_operand.vmem [shape: bf16[512,128], index: 0, kind: input, shape index: {}]   ;;  %s1375_s1 = inlined_call_operand.vmem [shape: bf16[64,512], index: 1, kind: input, shape index: {}]   ;;  %s1376_s2 = inlined_call_operand.vmem [shape: f32[64,1], index: 2, kind: input, shape index: {}]   ;;  %s1377_s3 = inlined_call_operand.vmem [shape: f32[64,128], index: 3, kind: input, shape index: {}]   ;;  %s1378_s4 = inlined_call_operand.vmem [shape: f32[128,2], index: 4, kind: input, shape index: {}]   ;;  %s1379_s5 = inlined_call_operand.hbm [shape: f32[1,2], index: 5, kind: output, shape index: {}]  }
   0x1   :  { %v998_v0 = vld [vmem:[%s1374_s0 + $0x40] sm:$0xff]   ;;  %996 = vset.pattern.permute.xlu0 %v1082_v2  ;;  %997 = vset.pattern.permute.xlu1 %v1082_v2  ;;  %v1002_v5 = vld [vmem:[%s1374_s0 + $0x48] sm:$0xff]   ;;  %v1006_v9 = vld [vmem:[%s1374_s0 + $0x50] sm:$0xff]  }
   0x2   :  { %v999_v1 = vld [vmem:[%s1374_s0 + $0xc0] sm:$0xff]   ;;  %798 = vmatprep.subr.bf16.mxu0 %v998_v0  ;;  %v1003_v6 = vld [vmem:[%s1374_s0 + $0xc8] sm:$0xff]   ;;  %v1007_v10 = vld [vmem:[%s1374_s0 + $0xd0] sm:$0xff]  }
   0x3   :  { %v1000_v3 = vld [vmem:[%s1374_s0] sm:$0xff]   ;;  %838 = vmatprep.subr.bf16.mxu1 %v999_v1  ;;  %v1004_v7 = vld [vmem:[%s1374_s0 + $0x8] sm:$0xff]   ;;  %v1008_v11 = vld [vmem:[%s1374_s0 + $0x10] sm:$0xff]  }
   0x4   :  { %v1001_v4 = vld [vmem:[%s1374_s0 + $0x80] sm:$0xff]   ;;  %799 = vmatpush3.bf16.msra.mxu0 %v1000_v3  ;;  %v1005_v8 = vld [vmem:[%s1374_s0 + $0x88] sm:$0xff]   ;;  %v1009_v12 = vld [vmem:[%s1374_s0 + $0x90] sm:$0xff]  }
   0x5   :  { %839 = vmatpush3.bf16.msra.mxu1 %v1001_v4  ;;  %800 = vmatprep.subr.bf16.mxu0 %v1002_v5  ;;  %v1010_v13 = vld [vmem:[%s1374_s0 + $0x58] sm:$0xff]   ;;  %v1014_v17 = vld [vmem:[%s1374_s0 + $0x60] sm:$0xff]   ;;  %v1018_v21 = vld [vmem:[%s1374_s0 + $0x68] sm:$0xff]  }
   0x6   :  { %840 = vmatprep.subr.bf16.mxu1 %v1003_v6  ;;  %v1011_v14 = vld [vmem:[%s1374_s0 + $0xd8] sm:$0xff]   ;;  %v1015_v18 = vld [vmem:[%s1374_s0 + $0xe0] sm:$0xff]   ;;  %v1019_v22 = vld [vmem:[%s1374_s0 + $0xe8] sm:$0xff]  }
   0x7   :  { %v1012_v15 = vld [vmem:[%s1374_s0 + $0x18] sm:$0xff]   ;;  %v1016_v19 = vld [vmem:[%s1374_s0 + $0x20] sm:$0xff]   ;;  %v1020_v23 = vld [vmem:[%s1374_s0 + $0x28] sm:$0xff]  }
   0x8   :  { %801 = vmatpush3.bf16.msra.mxu0 %v1004_v7  ;;  %v1013_v16 = vld [vmem:[%s1374_s0 + $0x98] sm:$0xff]   ;;  %v1017_v20 = vld [vmem:[%s1374_s0 + $0xa0] sm:$0xff]   ;;  %v1021_v24 = vld [vmem:[%s1374_s0 + $0xa8] sm:$0xff]  }
   0x9   :  { %841 = vmatpush3.bf16.msra.mxu1 %v1005_v8  ;;  %802 = vmatprep.subr.bf16.mxu0 %v1006_v9  ;;  %v1022_v25 = vld [vmem:[%s1374_s0 + $0x70] sm:$0xff]   ;;  %v1026_v29 = vld [vmem:[%s1374_s0 + $0x78] sm:$0xff]   ;;  %v102_v43 = vld [vmem:[%s1376_s2] sm:$0xff] }
   0xa   :  { %842 = vmatprep.subr.bf16.mxu1 %v1007_v10  ;;  %v1023_v26 = vld [vmem:[%s1374_s0 + $0xf0] sm:$0xff]   ;;  %v1027_v30 = vld [vmem:[%s1374_s0 + $0xf8] sm:$0xff]   ;;  %112 = vperm.xlu0 %996, %v102_v43   ;;  %v103_v45 = vld [vmem:[%s1376_s2 + $0x8] sm:$0xff] }
   0xb   :  { %v1024_v27 = vld [vmem:[%s1374_s0 + $0x30] sm:$0xff]   ;;  %v1028_v31 = vld [vmem:[%s1374_s0 + $0x38] sm:$0xff]   ;;  %v584_v47 = vld [vmem:[%s1378_s4] sm:$0xff] }
   0xc   :  { %803 = vmatpush3.bf16.msra.mxu0 %v1008_v11  ;;  %v1025_v28 = vld [vmem:[%s1374_s0 + $0xb0] sm:$0xff]   ;;  %v1029_v32 = vld [vmem:[%s1374_s0 + $0xb8] sm:$0xff]   ;;  %v585_v48 = vld [vmem:[%s1378_s4 + $0x8] sm:$0xff] }
   0xd   :  { %843 = vmatpush3.bf16.msra.mxu1 %v1009_v12  ;;  %804 = vmatprep.subr.bf16.mxu0 %v1010_v13  ;;  %v1030_v33 = vld [vmem:[%s1375_s1] ss:$16 sps:$4 sm:$0xff]   ;;  %v1032_v34 = vld [vmem:[%s1375_s1 + $0x4] ss:$16 sps:$4 sm:$0xff]   ;;  %v1033_v35 = vld [vmem:[%s1375_s1 + $0x8] ss:$16 sps:$4 sm:$0xff]   ;;  %v946_v49 = vpack.c.bf16 %v585_v48, %v584_v47 }
   0xe   :  { %844 = vmatprep.subr.bf16.mxu1 %v1011_v14  ;;  %v1035_v36 = vld [vmem:[%s1375_s1 + $0xc] ss:$16 sps:$4 sm:$0xff]   ;;  %454 = vmatprep.mubr.bf16.mxu0 %v1032_v34  ;;  %v1036_v37 = vld [vmem:[%s1375_s1 + $0x24] ss:$16 sps:$4 sm:$0xff]   ;;  %v1040_v39 = vld [vmem:[%s1375_s1 + $0x20] ss:$16 sps:$4 sm:$0xff]  }
   0xf   :  { %519 = vmatprep.mubr.bf16.mxu1 %v1035_v36  ;;  %v1038_v38 = vld [vmem:[%s1375_s1 + $0x2c] ss:$16 sps:$4 sm:$0xff]   ;;  %v1041_v40 = vld [vmem:[%s1375_s1 + $0x28] ss:$16 sps:$4 sm:$0xff]   ;;  %v1042_v41 = vld [vmem:[%s1375_s1 + $0x44] ss:$16 sps:$4 sm:$0xff]   ;;  %117 = vperm.xlu0 %996, %v103_v45  }
  0x10   :  { %805 = vmatpush3.bf16.msra.mxu0 %v1012_v15  ;;  %v1044_v42 = vld [vmem:[%s1375_s1 + $0x4c] ss:$16 sps:$4 sm:$0xff]   ;;  %v104_v44 = vld [vmem:[%s1376_s2 + $0x10] sm:$0xff]  ;;  %v106_v53 = vld [vmem:[%s1376_s2 + $0x20] sm:$0xff] }
  0x11   :  { %845 = vmatpush3.bf16.msra.mxu1 %v1013_v16  ;;  %806 = vmatprep.subr.bf16.mxu0 %v1014_v17  ;;  %v105_v46 = vld [vmem:[%s1376_s2 + $0x18] sm:$0xff]  ;;  %v586_v50 = vld [vmem:[%s1378_s4 + $0x10] sm:$0xff]  ;;  %v588_v55 = vld [vmem:[%s1378_s4 + $0x20] sm:$0xff] }
  0x12   :  { %846 = vmatprep.subr.bf16.mxu1 %v1015_v18  ;;  %122 = vperm.xlu1 %997, %v104_v44   ;;  %v587_v51 = vld [vmem:[%s1378_s4 + $0x18] sm:$0xff]  ;;  %v1046_v52 = vld [vmem:[%s1375_s1 + $0x40] ss:$16 sps:$4 sm:$0xff]   ;;  %v589_v56 = vld [vmem:[%s1378_s4 + $0x28] sm:$0xff] }
  0x13   :  { %v950_v54 = vpack.c.bf16 %v587_v51, %v586_v50 }
  0x14   :  { %807 = vmatpush3.bf16.msra.mxu0 %v1016_v19 }
  0x15   :  { %847 = vmatpush3.bf16.msra.mxu1 %v1017_v20  ;;  %808 = vmatprep.subr.bf16.mxu0 %v1018_v21 }
  0x16   :  { %848 = vmatprep.subr.bf16.mxu1 %v1019_v22  ;;  %127 = vperm.xlu1 %997, %v105_v46  }
  0x18   :  { %809 = vmatpush3.bf16.msra.mxu0 %v1020_v23 }
  0x19   :  { %849 = vmatpush3.bf16.msra.mxu1 %v1021_v24  ;;  %810 = vmatprep.subr.bf16.mxu0 %v1022_v25 }
  0x1a   :  { %850 = vmatprep.subr.bf16.mxu1 %v1023_v26 }
  0x1c   :  { %811 = vmatpush3.bf16.msra.mxu0 %v1024_v27 }
  0x1d   :  { %851 = vmatpush3.bf16.msra.mxu1 %v1025_v28  ;;  %812 = vmatprep.subr.bf16.mxu0 %v1026_v29 }
  0x1e   :  { %852 = vmatprep.subr.bf16.mxu1 %v1027_v30 }
  0x20   :  { %813 = vmatpush3.bf16.msra.mxu0 %v1028_v31 }
  0x21   :  { %853 = vmatpush3.bf16.msra.mxu1 %v1029_v32  ;;  %947 = vmatprep.subr.bf16.mxu0 %v946_v49 }
  0x23   :  { %455 = vmatmul.mubr.bf16.vlgmr.msra.gmra.mrb[0].mxu0 %v1030_v33 }
  0x24   :  { %520 = vmatmul.mubr.bf16.vlgmr.msra.gmra.mrb[0].mxu1 %v1033_v35  ;;  %462 = vmatprep.mubr.bf16.mxu0 %v1036_v37 }
  0x25   :  { %527 = vmatprep.mubr.bf16.mxu1 %v1038_v38 }
  0x2b   :  { %463 = vmatmul.mubr.bf16.gmra.mrb[4].mxu0 %v1040_v39 }
  0x2c   :  { %528 = vmatmul.mubr.bf16.gmra.mrb[4].mxu1 %v1041_v40  ;;  %470 = vmatprep.mubr.bf16.mxu0 %v1042_v41 }
  0x2d   :  { %535 = vmatprep.mubr.bf16.mxu1 %v1044_v42 }
  0x2e   :  { %10 = vsyncpa [#allocation3], 0  ;;  %v1047_v57 = vld [vmem:[%s1375_s1 + $0x48] ss:$16 sps:$4 sm:$0xff]   ;;  %v1048_v58 = vld [vmem:[%s1375_s1 + $0x64] ss:$16 sps:$4 sm:$0xff]   ;;  %949 = vmatpush3.bf16.msra.mxu0 %v946_v49  ;;  %978 = vmatprep.subr.bf16.mxu1 %v946_v49  ;;  %v954_v61 = vpack.c.bf16 %v589_v56, %v588_v55 }
  0x2f   :  { %v107_v59 = vld [vmem:[%s1376_s2 + $0x28] sm:$0xff]  ;;  %951 = vmatprep.subr.bf16.mxu0 %v950_v54  ;;  %986 = vmatpush3.bf16.msra.mxu1 %v946_v49  ;;  %v108_v62 = vld [vmem:[%s1376_s2 + $0x30] sm:$0xff]  ;;  %v591_v0 = vld [vmem:[%s1378_s4 + $0x38] sm:$0xff]  ;;  %vm705_vm0 = vcmask 15360   ;;  %vm733_vm1 = vcmask 8192  }
  0x30   :  { %v1050_v60 = vld [vmem:[%s1375_s1 + $0x6c] ss:$16 sps:$4 sm:$0xff]   ;;  %132 = vperm.xlu0 %996, %v106_v53   ;;  %979 = vmatprep.subr.bf16.mxu1 %v950_v54  ;;  %v590_v63 = vld [vmem:[%s1378_s4 + $0x30] sm:$0xff]  ;;  %v1053_v4 = vld [vmem:[%s1375_s1 + $0x68] ss:$16 sps:$4 sm:$0xff]  }
  0x31   :  { %137 = vperm.xlu1 %997, %v107_v59   ;;  %v109_v1 = vld [vmem:[%s1376_s2 + $0x38] sm:$0xff]  ;;  %v958_v2 = vpack.c.bf16 %v591_v0, %v590_v63  ;;  %v1052_v3 = vld [vmem:[%s1375_s1 + $0x60] ss:$16 sps:$4 sm:$0xff]   ;;  %v593_v6 = vld [vmem:[%s1378_s4 + $0x48] sm:$0xff] }
  0x32   :  { %953 = vmatpush3.bf16.msra.mxu0 %v950_v54  ;;  %v592_v5 = vld [vmem:[%s1378_s4 + $0x40] sm:$0xff]  ;;  %v594_v8 = vld [vmem:[%s1378_s4 + $0x50] sm:$0xff]  ;;  %v595_v9 = vld [vmem:[%s1378_s4 + $0x58] sm:$0xff] }
  0x33   :  { %471 = vmatmul.mubr.bf16.gmra.mrb[8].mxu0 %v1046_v52  ;;  %955 = vmatprep.subr.bf16.mxu0 %v954_v61  ;;  %v962_v7 = vpack.c.bf16 %v593_v6, %v592_v5  ;;  %v966_v10 = vpack.c.bf16 %v595_v9, %v594_v8  ;;  %v596_v11 = vld [vmem:[%s1378_s4 + $0x60] sm:$0xff]  ;;  %v597_v12 = vld [vmem:[%s1378_s4 + $0x68] sm:$0xff]  ;;  %v598_v14 = vld [vmem:[%s1378_s4 + $0x70] sm:$0xff] }
  0x34   :  { %536 = vmatmul.mubr.bf16.gmra.mrb[8].mxu1 %v1047_v57  ;;  %478 = vmatprep.mubr.bf16.mxu0 %v1048_v58  ;;  %v970_v13 = vpack.c.bf16 %v597_v12, %v596_v11  ;;  %v599_v15 = vld [vmem:[%s1378_s4 + $0x78] sm:$0xff]  ;;  %v568_v40 = vld [vmem:[%s1377_s3] sm:$0xff]  ;;  %v569_v46 = vld [vmem:[%s1377_s3 + $0x8] sm:$0xff] }
  0x35   :  { %543 = vmatprep.mubr.bf16.mxu1 %v1050_v60  ;;  %142 = vperm.xlu0 %996, %v108_v62   ;;  %v974_v16 = vpack.c.bf16 %v599_v15, %v598_v14  ;;  %v571_v11 = vld [vmem:[%s1377_s3 + $0x18] sm:$0xff] }
  0x36   :  { %147 = vperm.xlu1 %997, %v109_v1   ;;  %987 = vmatpush3.bf16.msra.mxu1 %v950_v54 }
  0x37   :  { %980 = vmatprep.subr.bf16.mxu1 %v954_v61  ;;  %957 = vmatpush3.bf16.msra.mxu0 %v954_v61 }
  0x38   :  { %959 = vmatprep.subr.bf16.mxu0 %v958_v2 }
  0x3a   :  { %988 = vmatpush3.bf16.msra.mxu1 %v954_v61 }
  0x3b   :  { %479 = vmatmul.mubr.bf16.gmra.mrb[12].mxu0 %v1052_v3  ;;  %981 = vmatprep.subr.bf16.mxu1 %v958_v2 }
  0x3c   :  { %544 = vmatmul.mubr.bf16.gmra.mrb[12].mxu1 %v1053_v4  ;;  %961 = vmatpush3.bf16.msra.mxu0 %v958_v2 }
  0x3d   :  { %963 = vmatprep.subr.bf16.mxu0 %v962_v7 }
  0x3e   :  { %989 = vmatpush3.bf16.msra.mxu1 %v958_v2  ;;  %v570_v2 = vld [vmem:[%s1377_s3 + $0x10] sm:$0xff] }
  0x3f   :  { %982 = vmatprep.subr.bf16.mxu1 %v962_v7 }
  0x40   :  { %965 = vmatpush3.bf16.msra.mxu0 %v962_v7 }
  0x41   :  { %967 = vmatprep.subr.bf16.mxu0 %v966_v10 }
  0x42   :  { %990 = vmatpush3.bf16.msra.mxu1 %v962_v7 }
  0x43   :  { %983 = vmatprep.subr.bf16.mxu1 %v966_v10 }
  0x44   :  { %969 = vmatpush3.bf16.msra.mxu0 %v966_v10 }
  0x45   :  { %971 = vmatprep.subr.bf16.mxu0 %v970_v13 }
  0x46   :  { %991 = vmatpush3.bf16.msra.mxu1 %v966_v10 }
  0x47   :  { %984 = vmatprep.subr.bf16.mxu1 %v970_v13 }
  0x48   :  { %973 = vmatpush3.bf16.msra.mxu0 %v970_v13 }
  0x49   :  { %975 = vmatprep.subr.bf16.mxu0 %v974_v16 }
  0x4a   :  { %992 = vmatpush3.bf16.msra.mxu1 %v970_v13 }
  0x4b   :  { %985 = vmatprep.subr.bf16.mxu1 %v974_v16 }
  0x4c   :  { %977 = vmatpush3.bf16.msra.mxu0 %v974_v16 }
  0x4e   :  { %993 = vmatpush3.bf16.msra.mxu1 %v974_v16 }
  0x89   :  { %v113_v17 = vpop.permute.xlu0 %112 }
  0x8e   :  { %v118_v19 = vpop.permute.xlu0 %117 }
  0x91   :  { %v123_v34 = vpop.permute.xlu1 %122 }
  0x95   :  { %v128_v55 = vpop.permute.xlu1 %127 }
  0xaf   :  { %v133_v60 = vpop.permute.xlu0 %132 }
  0xf6   :  { %v814_v18 = vpop.f32.mrb[0].mxu0 }
  0xf7   :  { %v854_v20 = vpop.f32.mrb[0].mxu1  ;;  %v815_v21 = vpop.f32.mrb[1].mxu0 }
  0xf8   :  { %v816_v22 = vadd.f32 %v815_v21, %v814_v18  ;;  %v855_v23 = vpop.f32.mrb[1].mxu1  ;;  %v817_v24 = vpop.f32.mrb[2].mxu0 }
  0xf9   :  { %v856_v25 = vadd.f32 %v855_v23, %v854_v20  ;;  %v857_v26 = vpop.f32.mrb[2].mxu1  ;;  %v818_v27 = vpop.f32.mrb[3].mxu0 }
  0xfa   :  { %v457_v28 = vadd.f32 %v816_v22, %v113_v17  ;;  %v819_v29 = vadd.f32 %v818_v27, %v817_v24  ;;  %v858_v30 = vpop.f32.mrb[3].mxu1  ;;  %v138_v17 = vpop.permute.xlu1 %137 }
  0xfb   :  { %v859_v31 = vadd.f32 %v858_v30, %v857_v26  ;;  %v143_v22 = vpop.permute.xlu0 %142 }
  0xfc   :  { %v522_v32 = vadd.f32 %v856_v25, %v457_v28  ;;  %v460_v33 = vadd.f32 %v819_v29, %v118_v19  ;;  %v572_v28 = vld [vmem:[%s1377_s3 + $0x20] sm:$0xff] }
  0xfe   :  { %v552_v35 = vmul.f32 0.2, %v522_v32  ;;  %v525_v36 = vadd.f32 %v859_v31, %v460_v33  ;;  %v820_v37 = vpop.f32.mrb[4].mxu0 }
  0xff   :  { %v860_v38 = vpop.f32.mrb[4].mxu1  ;;  %v821_v39 = vpop.f32.mrb[5].mxu0 }
 0x100   :  { %v560_v41 = vmax.f32 %v522_v32, %v552_v35  ;;  %v553_v42 = vmul.f32 0.2, %v525_v36  ;;  %v822_v43 = vadd.f32 %v821_v39, %v820_v37  ;;  %v861_v44 = vpop.f32.mrb[5].mxu1  ;;  %v823_v45 = vpop.f32.mrb[6].mxu0 }
 0x101   :  { %v862_v47 = vadd.f32 %v861_v44, %v860_v38  ;;  %v863_v48 = vpop.f32.mrb[6].mxu1  ;;  %v824_v49 = vpop.f32.mrb[7].mxu0 }
 0x102   :  { %v561_v50 = vmax.f32 %v525_v36, %v553_v42  ;;  %v465_v51 = vadd.f32 %v822_v43, %v123_v34  ;;  %v825_v52 = vadd.f32 %v824_v49, %v823_v45  ;;  %v864_v53 = vpop.f32.mrb[7].mxu1  ;;  %v576_v54 = vmul.f32 %v568_v40, %v560_v41  ;;  %v573_v34 = vld [vmem:[%s1377_s3 + $0x28] sm:$0xff]  ;;  %v148_v43 = vpop.permute.xlu1 %147 }
 0x103   :  { %v865_v56 = vadd.f32 %v864_v53, %v863_v48  ;;  %v575_v53 = vld [vmem:[%s1377_s3 + $0x38] sm:$0xff] }
 0x104   :  { %v577_v57 = vmul.f32 %v569_v46, %v561_v50  ;;  %v530_v58 = vadd.f32 %v862_v47, %v465_v51  ;;  %v468_v59 = vadd.f32 %v825_v52, %v128_v55  ;;  %934 = vmatprep.mubr.f32.mxu0 %v576_v54  ;;  %v574_v50 = vld [vmem:[%s1377_s3 + $0x30] sm:$0xff]  ;;  %s1083_s3 = smov [#allocation2]  }
 0x105   :  { %s741_s20 = sshll.u32 %s1083_s3, 4  ;;  %s742_s20 = int_to_ptr.vmem [resolvable:$true] %s741_s20 }
 0x106   :  { %v554_v61 = vmul.f32 0.2, %v530_v58  ;;  %v533_v62 = vadd.f32 %v865_v56, %v468_v59  ;;  %v826_v63 = vpop.f32.mrb[8].mxu0  ;;  %935 = vmatmul.mubr.f32.vlgmr.msra.gmra.mrb[16].mxu0 %v577_v57  ;;  %s1058_s1 = scalar_lea.vmem %s742_s20, 16  ;;  %s1062_s21 = scalar_lea.vmem %s742_s20, 32 }
 0x107   :  { %v866_v0 = vpop.f32.mrb[8].mxu1  ;;  %v827_v1 = vpop.f32.mrb[9].mxu0  ;;  %p1059_p0 = scmp.ne.s32.totalorder %s742_s20, %s1058_s1  ;;  %p1063_p1 = scmp.lt.s32.totalorder %s742_s20, %s742_s20 }
 0x108   :  { %v562_v3 = vmax.f32 %v530_v58, %v554_v61  ;;  %v555_v4 = vmul.f32 0.2, %v533_v62  ;;  %v828_v5 = vadd.f32 %v827_v1, %v826_v63  ;;  %v867_v6 = vpop.f32.mrb[9].mxu1  ;;  %v829_v7 = vpop.f32.mrb[10].mxu0  ;;  %p1064_p2 = scmp.lt.s32.totalorder %s1062_s21, %s1058_s1 }
 0x109   :  { %v868_v8 = vadd.f32 %v867_v6, %v866_v0  ;;  %v869_v9 = vpop.f32.mrb[10].mxu1  ;;  %v830_v10 = vpop.f32.mrb[11].mxu0 }
 0x10a   :  { %v563_v12 = vmax.f32 %v533_v62, %v555_v4  ;;  %v473_v13 = vadd.f32 %v828_v5, %v133_v60  ;;  %v831_v14 = vadd.f32 %v830_v10, %v829_v7  ;;  %v870_v15 = vpop.f32.mrb[11].mxu1  ;;  %v578_v16 = vmul.f32 %v570_v2, %v562_v3  ;;  %p1065_p3 = por %p1064_p2, %p1063_p1 }
 0x10b   :  { %v871_v18 = vadd.f32 %v870_v15, %v869_v9 }
 0x10c   :  { %v538_v19 = vadd.f32 %v868_v8, %v473_v13  ;;  %v476_v20 = vadd.f32 %v831_v14, %v138_v17  ;;  %937 = vmatprep.mubr.f32.mxu0 %v578_v16  ;;  %v579_v21 = vmul.f32 %v571_v11, %v563_v12  ;;  %p1066_p4 = pnand %p1065_p3, %p1059_p0 }
 0x10e   :  { %v556_v23 = vmul.f32 0.2, %v538_v19  ;;  %v541_v24 = vadd.f32 %v871_v18, %v476_v20  ;;  %v832_v25 = vpop.f32.mrb[12].mxu0  ;;  %938 = vmatmul.mubr.f32.gmra.mrb[18].mxu0 %v579_v21 }
 0x10f   :  { %v872_v26 = vpop.f32.mrb[12].mxu1  ;;  %v833_v27 = vpop.f32.mrb[13].mxu0 }
 0x110   :  { %v564_v29 = vmax.f32 %v538_v19, %v556_v23  ;;  %v557_v30 = vmul.f32 0.2, %v541_v24  ;;  %v834_v31 = vadd.f32 %v833_v27, %v832_v25  ;;  %v873_v32 = vpop.f32.mrb[13].mxu1  ;;  %v835_v33 = vpop.f32.mrb[14].mxu0 }
 0x111   :  { %v874_v35 = vadd.f32 %v873_v32, %v872_v26  ;;  %v875_v36 = vpop.f32.mrb[14].mxu1  ;;  %v836_v37 = vpop.f32.mrb[15].mxu0 }
 0x112   :  { %v565_v38 = vmax.f32 %v541_v24, %v557_v30  ;;  %v481_v39 = vadd.f32 %v834_v31, %v143_v22  ;;  %v837_v40 = vadd.f32 %v836_v37, %v835_v33  ;;  %v876_v41 = vpop.f32.mrb[15].mxu1  ;;  %v580_v42 = vmul.f32 %v572_v28, %v564_v29 }
 0x113   :  { %v877_v44 = vadd.f32 %v876_v41, %v875_v36 }
 0x114   :  { %v581_v45 = vmul.f32 %v573_v34, %v565_v38  ;;  %v546_v46 = vadd.f32 %v874_v35, %v481_v39  ;;  %v484_v47 = vadd.f32 %v837_v40, %v148_v43  ;;  %940 = vmatprep.mubr.f32.mxu1 %v580_v42 }
 0x116   :  { %v558_v48 = vmul.f32 0.2, %v546_v46  ;;  %v549_v49 = vadd.f32 %v877_v44, %v484_v47  ;;  %941 = vmatmul.mubr.f32.vlgmr.msra.gmra.mrb[16].mxu1 %v581_v45 }
 0x118   :  { %v566_v51 = vmax.f32 %v546_v46, %v558_v48  ;;  %v559_v52 = vmul.f32 0.2, %v549_v49 }
 0x11a   :  { %v567_v54 = vmax.f32 %v549_v49, %v559_v52  ;;  %v582_v55 = vmul.f32 %v574_v50, %v566_v51 }
 0x11c   :  { %943 = vmatprep.mubr.f32.mxu1 %v582_v55  ;;  %v583_v56 = vmul.f32 %v575_v53, %v567_v54 }
 0x11e   :  { %944 = vmatmul.mubr.f32.gmra.mrb[18].mxu1 %v583_v56 }
 0x1d9   :  { %v936_v57 = vpop.f32.mrb[16].mxu0 }
 0x1da   :  { %v707_v58 = vsel %vm705_vm0, %v936_v57, 0.0  ;;  %v666_v59 = vpop.f32.mrb[17].mxu0 }
 0x1db   :  { %v706_v60 = vsel %vm705_vm0, %v666_v59, 0.0 }
 0x1dc   :  { %v708_v61 = vadd.f32 %v707_v58, %v706_v60 }
 0x1e1   :  { %v939_v62 = vpop.f32.mrb[18].mxu0 }
 0x1e2   :  { %v676_v63 = vpop.f32.mrb[19].mxu0  ;;  %v711_v2 = vsel %vm705_vm0, %v939_v62, 0.0 }
 0x1e3   :  { %v709_v0 = vsel %vm705_vm0, %v676_v63, 0.0 }
 0x1e4   :  { %v710_v1 = vadd.f32 %v709_v0, %v708_v61 }
 0x1e6   :  { %v712_v3 = vadd.f32 %v711_v2, %v710_v1 }
 0x1e9   :  { %v942_v4 = vpop.f32.mrb[16].mxu1 }
 0x1ea   :  { %v686_v5 = vpop.f32.mrb[17].mxu1  ;;  %v715_v8 = vsel %vm705_vm0, %v942_v4, 0.0 }
 0x1eb   :  { %v713_v6 = vsel %vm705_vm0, %v686_v5, 0.0 }
 0x1ec   :  { %v714_v7 = vadd.f32 %v713_v6, %v712_v3 }
 0x1ee   :  { %v716_v9 = vadd.f32 %v715_v8, %v714_v7 }
 0x1f1   :  { %v945_v10 = vpop.f32.mrb[18].mxu1 }
 0x1f2   :  { %v696_v11 = vpop.f32.mrb[19].mxu1  ;;  %v719_v14 = vsel %vm705_vm0, %v945_v10, 0.0 }
 0x1f3   :  { %v717_v12 = vsel %vm705_vm0, %v696_v11, 0.0 }
 0x1f4   :  { %v718_v13 = vadd.f32 %v717_v12, %v716_v9 }
 0x1f6   :  { %v720_v15 = vadd.f32 %v719_v14, %v718_v13 }
 0x1f8   :  { %v721_v16 = vrot.slane %v720_v15, 4 }
 0x1fa   :  { %v722_v17 = vadd.f32 %v721_v16, %v720_v15 }
 0x1fc   :  { %v723_v18 = vrot.slane %v722_v17, 2 }
 0x1fe   :  { %v724_v19 = vadd.f32 %v723_v18, %v722_v17 }
 0x200   :  { %v725_v20 = vrot.slane %v724_v19, 1 }
 0x202   :  { %v726_v21 = vadd.f32 %v725_v20, %v724_v19 }
 0x204   :  { %v797_v22 = vmul.f32 -1.442695, %v726_v21 }
 0x206   :  { %1054 = vpow2.f32 %v797_v22 }
 0x210   :  { %v1055_v23 = vpop.eup %1054 }
 0x211   :  { %v730_v24 = vadd.f32 1.0, %v1055_v23 }
 0x213   :  { %1056 = vrcp.f32 %v730_v24 }
 0x21d   :  { %v1057_v25 = vpop.eup %1056 }
 0x21e   :  { %734 = vst.msk [vmem:[#allocation2] sm:$0x1] %vm733_vm1, %v1057_v25 }
 0x21f   :  { %1069 = shalt.err (!%p1066_p4)
}
 0x220   :  { %s1070_s24 = scalar_lea.hbm %s1379_s5, 16 }
 0x221   :  { %p1071_p5 = scmp.ne.s32.totalorder %s1379_s5, %s1070_s24  ;;  %p1074_p6 = scmp.lt.u32.totalorder %s1070_s24, %s1379_s5 }
 0x223   :  { %p1076_p7 = pnand %p1074_p6, %p1071_p5 }
 0x225   :  { %1079 = shalt.err (!%p1076_p7)
}
 0x226   :  { %744 = dma.vmem_to_hbm [thread:$0]  %s742_s20, 16, %s1379_s5, [#allocation3]  }
 0x227   :  { %1080 = dma.done.wait [#allocation3], 16  }
 0x228   :  { %1081 = vsyncadd [#allocation3], 4294967280 }
 0x229   :  { %748 = vsyncpa [#allocation3], 1 }

</bundles_post_ra>
